<compile_context>
chip_gen: v5e
topology: v5e:2x2
jax: 0.10.0
libtpu: 0.0.40
codegen_flags: <defaults>
</compile_context>

<pallas_src>
import jax
import jax.numpy as jnp
from jax.experimental import pallas as pl
from jax.experimental.pallas import tpu as pltpu

F_PAD = 128        # feature lanes: every layer dim (16/32/64) padded to one vreg lane width
NEG_SLOPE = 0.2
MASK_VAL = -1e30


def _round_up(v, m):
    return ((v + m - 1) // m) * m


def _pad2(a, rows, cols):
    out = jnp.zeros((rows, cols), a.dtype)
    return out.at[: a.shape[0], : a.shape[1]].set(a)


# ------------------------------------------------------------------
# Fused forward kernel (one grid step per graph-batch tile; everything VMEM-resident)
# ------------------------------------------------------------------
def make_gat_block_mix_kernel(node_pad, f_pad=F_PAD):
    F = f_pad
    NP = node_pad

    def kernel(x_ref, madj_ref, madjn_ref, pool_ref,
               wext0_ref, wext_o_ref, b_o_ref, wext_n_ref, b_n_ref,
               wf2_ref, bf2_ref, out_ref):
        madj = madj_ref[...]            # f32 additive mask [NP, NP] (0 edge / -1e30 non-edge)
        madjn = madjn_ref[...]

        def attend(h, d_np, s_b, mask_add, bias, apply_relu):
            # h   : [NP, F]  f32  H = X @ W
            # d_np: [NP, NP] f32  dst score a_dst.H_i broadcast along lanes (from the matmul)
            # s_b : [NP, F]  f32  src score a_src.H_j broadcast along lanes
            s_row = s_b.T[0:1, :]                        # [1, NP]: tiny transpose, not 128x128
            e = d_np + s_row                             # e[i, j] = a_dst.H_i + a_src.H_j
            e = jnp.maximum(e, NEG_SLOPE * e) + mask_add # LeakyReLU(0.2) then additive edge mask
            m = jnp.max(e, axis=-1, keepdims=True)
            p = jnp.exp(e - m)                           # masked entries -> exp(-huge) == 0
            denom = jnp.sum(p, axis=-1, keepdims=True)   # > 0: self-loop always present
            alpha = (p * pl.reciprocal(denom, approx=True)).astype(jnp.bfloat16)
            out = jnp.dot(alpha, h.astype(jnp.bfloat16),
                          preferred_element_type=jnp.float32) + bias
            if apply_relu:
                out = jnp.maximum(out, 0.0)
            return out

        x_b = x_ref[...]                                 # bf16 [NP, F]

        # ---- layer 0: both convs share the input -> one wide feature matmul, then split ----
        hb = jnp.dot(x_b, wext0_ref[...], preferred_element_type=jnp.float32)   # [NP, 6F]
        o = attend(hb[:, 0:F], hb[:, 2 * F:2 * F + NP], hb[:, F:2 * F],
                   madj, b_o_ref[0], apply_relu=False)
        nb = attend(hb[:, 3 * F:4 * F], hb[:, 5 * F:5 * F + NP], hb[:, 4 * F:5 * F],
                    madjn, b_n_ref[0], apply_relu=False)
        o_in, nb_in = o.astype(jnp.bfloat16), nb.astype(jnp.bfloat16)

        # ---- layers 1..2: ReLU on conv outputs, exactly as in the reference loop ----
        for i in range(2):
            ho = jnp.dot(o_in, wext_o_ref[i], preferred_element_type=jnp.float32)   # [NP, 3F]
            hn = jnp.dot(nb_in, wext_n_ref[i], preferred_element_type=jnp.float32)
            o = attend(ho[:, 0:F], ho[:, 2 * F:2 * F + NP], ho[:, F:2 * F],
                       madj, b_o_ref[i + 1], apply_relu=True)
            nb = attend(hn[:, 0:F], hn[:, 2 * F:2 * F + NP], hn[:, F:2 * F],
                        madjn, b_n_ref[i + 1], apply_relu=True)
            o_in, nb_in = o.astype(jnp.bfloat16), nb.astype(jnp.bfloat16)

        # Only layer-2 fusion is live (layer-0/1 fusion outputs are overwritten before use).
        # Single K=2F matmul on the lane-concatenated [o | nb], then fused mean-pool (f32).
        cat = jnp.concatenate([o_in, nb_in], axis=-1)                        # [NP, 2F] bf16
        fused = jnp.dot(cat, wf2_ref[...], preferred_element_type=jnp.float32) + bf2_ref[...]
        out_ref[...] = jnp.dot(pool_ref[...], fused, preferred_element_type=jnp.float32)

    return kernel


# ------------------------------------------------------------------
# Host-side packing: fold a_src/a_dst into W, pad lane-dense, stack per layer.
# Call ONCE per model (hoisted out of the forward path).
# ------------------------------------------------------------------
def _make_wext(p, f_pad=F_PAD):
    F = f_pad
    fin = p["w"].shape[0]
    ws = jnp.broadcast_to(p["w"] @ p["a_src"], (fin, F))
    wd = jnp.broadcast_to(p["w"] @ p["a_dst"], (fin, F))
    wext = jnp.concatenate(
        [_pad2(p["w"], F, F), _pad2(ws, F, F), _pad2(wd, F, F)], axis=1)
    return wext.astype(jnp.bfloat16)                     # [F, 3F]


def pack_params(params, f_pad=F_PAD):
    F = f_pad
    wext_o = [_make_wext(p, F) for p in params["conv"]]
    wext_n = [_make_wext(p, F) for p in params["conv_nb"]]
    pf = params["fusion"][2]                             # only layer-2 fusion is live
    return dict(
        wext0=jnp.concatenate([wext_o[0], wext_n[0]], axis=1),     # [F, 6F] bf16 (shared input)
        wext_o=jnp.stack(wext_o[1:]),                               # [2, F, 3F] bf16
        wext_n=jnp.stack(wext_n[1:]),
        b_o=jnp.stack([_pad2(p["b"], 1, F) for p in params["conv"]]),      # [3,1,F] f32
        b_n=jnp.stack([_pad2(p["b"], 1, F) for p in params["conv_nb"]]),
        wf2=jnp.concatenate([_pad2(pf["w1"], F, F),
                             _pad2(pf["w2"], F, F)], axis=0).astype(jnp.bfloat16),  # [2F, F]
        bf2=_pad2(pf["b"], 1, F),                                    # [1, F] f32
    )


# ------------------------------------------------------------------
# Graph-side prep (additive mask + mean-pool matrix).
# ------------------------------------------------------------------
def edges_to_addmask(edge_index, node_pad):
    adj = jnp.zeros((node_pad, node_pad), jnp.float32)
    adj = adj.at[edge_index[1], edge_index[0]].set(1.0)   # adj[dst, src] = 1 (PyG convention)
    adj = adj + jnp.eye(node_pad, dtype=jnp.float32)      # add_self_loops=True (padded rows too)
    return jnp.where(adj > 0.0, 0.0, MASK_VAL).astype(jnp.float32)


def batch_to_pool(batch, num_graphs, node_pad, g_pad):
    onehot = (batch[None, :] == jnp.arange(num_graphs)[:, None]).astype(jnp.float32)  # [G, N]
    counts = jnp.maximum(onehot.sum(axis=1, keepdims=True), 1.0)
    return _pad2(onehot / counts, g_pad, node_pad)


# ------------------------------------------------------------------
# Parameter construction (deterministic synthetic init mirroring the module).
# ------------------------------------------------------------------
def init_params(key, gcn_layers_dim):
    def gat_params(k, fin, fout):
        k1, k2, k3, k4 = jax.random.split(k, 4)
        return dict(
            w=0.1 * jax.random.normal(k1, (fin, fout), jnp.float32),
            a_src=0.1 * jax.random.normal(k2, (fout, 1), jnp.float32),
            a_dst=0.1 * jax.random.normal(k3, (fout, 1), jnp.float32),
            b=0.1 * jax.random.normal(k4, (1, fout), jnp.float32),
        )

    def fusion_params(k, fout):
        k1, k2, k3 = jax.random.split(k, 3)
        return dict(
            w1=0.1 * jax.random.normal(k1, (fout, fout), jnp.float32),
            w2=0.1 * jax.random.normal(k2, (fout, fout), jnp.float32),
            b=0.1 * jax.random.normal(k3, (1, fout), jnp.float32),
        )

    keys = jax.random.split(key, 9)
    params = {"conv": [], "conv_nb": [], "fusion": []}
    for i in range(3):
        fin, fout = gcn_layers_dim[i], gcn_layers_dim[i + 1]
        params["conv"].append(gat_params(keys[3 * i + 0], fin, fout))
        params["conv_nb"].append(gat_params(keys[3 * i + 1], fin, fout))
        params["fusion"].append(fusion_params(keys[3 * i + 2], fout))
    return params


# ------------------------------------------------------------------
# Full forward (mirrors GATBlock_MIX.forward; dropout is an eval-mode no-op).
# ------------------------------------------------------------------
def gat_block_mix_forward(x, edge_index, edge_index_neighbor, batch, num_graphs,
                          packed, fout_last):
    n = x.shape[0]
    node_pad = max(_round_up(n, 8), 8)       # only real node rows (rounded to sublanes) do work
    g_pad = max(_round_up(num_graphs, 8), 8)

    # One graph-batch tile here; larger batches extend the node dim (block-diag adjacency) or
    # add tiles along the leading axis, which the 'parallel' grid shards over v7x's 2 cores.
    x_p = _pad2(x, node_pad, F_PAD).astype(jnp.bfloat16)[None]
    madj = edges_to_addmask(edge_index, node_pad)[None]
    madjn = edges_to_addmask(edge_index_neighbor, node_pad)[None]
    pool = batch_to_pool(batch, num_graphs, node_pad, g_pad)[None]

    def tile_spec(a):
        return pl.BlockSpec((None,) + a.shape[1:], lambda t: (t, 0, 0))

    def full_spec(a):
        nd = a.ndim
        return pl.BlockSpec(a.shape, lambda t, _nd=nd: (0,) * _nd)

    kernel = make_gat_block_mix_kernel(node_pad, F_PAD)
    n_tiles = 1

    out = pl.pallas_call(
        kernel,
        out_shape=jax.ShapeDtypeStruct((n_tiles, g_pad, F_PAD), jnp.float32),
        grid=(n_tiles,),
        in_specs=[tile_spec(x_p), tile_spec(madj), tile_spec(madjn), tile_spec(pool),
                  full_spec(packed["wext0"]),
                  full_spec(packed["wext_o"]), full_spec(packed["b_o"]),
                  full_spec(packed["wext_n"]), full_spec(packed["b_n"]),
                  full_spec(packed["wf2"]), full_spec(packed["bf2"])],
        out_specs=pl.BlockSpec((None, g_pad, F_PAD), lambda t: (t, 0, 0)),
        compiler_params=pltpu.CompilerParams(dimension_semantics=("parallel",)),
    )(x_p, madj, madjn, pool,
      packed["wext0"], packed["wext_o"], packed["b_o"],
      packed["wext_n"], packed["b_n"], packed["wf2"], packed["bf2"])

    return out[0, :num_graphs, :fout_last]


# ------------------------------------------------------------------
# Pure-JAX f32 reference (mirrors the PyTorch forward) for a tolerance check.
# ------------------------------------------------------------------
def reference_forward(x, edge_index, edge_index_neighbor, batch, num_graphs, params):
    n = x.shape[0]

    def gat_conv(p, h_in, ei):
        H = h_in @ p["w"]
        s = (H @ p["a_src"])[:, 0]
        d = (H @ p["a_dst"])[:, 0]
        adj = jnp.zeros((n, n), bool).at[ei[1], ei[0]].set(True)
        adj = adj | jnp.eye(n, dtype=bool)
        e = d[:, None] + s[None, :]
        e = jnp.where(e > 0, e, NEG_SLOPE * e)
        e = jnp.where(adj, e, -jnp.inf)
        a = jax.nn.softmax(e, axis=-1)
        return a @ H + p["b"]

    o = gat_conv(params["conv"][0], x, edge_index)
    nb = gat_conv(params["conv_nb"][0], x, edge_index_neighbor)
    for i in range(1, 3):
        o = jax.nn.relu(gat_conv(params["conv"][i], o, edge_index))
        nb = jax.nn.relu(gat_conv(params["conv_nb"][i], nb, edge_index_neighbor))
    pf = params["fusion"][2]
    fused = o @ pf["w1"] + nb @ pf["w2"] + pf["b"]
    onehot = (batch[None, :] == jnp.arange(num_graphs)[:, None]).astype(jnp.float32)
    counts = jnp.maximum(onehot.sum(axis=1, keepdims=True), 1.0)
    return (onehot / counts) @ fused


if __name__ == "__main__":
    key = jax.random.PRNGKey(0)
    k_param, k_x, k_e1, k_e2 = jax.random.split(key, 4)

    # Small shapes: 16 nodes, 2 graphs, feature dims [16, 16, 32, 64].
    N = 16
    G = 2
    gcn_layers_dim = [16, 16, 32, 64]

    x = jax.random.normal(k_x, (N, gcn_layers_dim[0]), jnp.float32)

    E = 32
    src1 = jax.random.randint(k_e1, (E,), 0, N)
    dst1 = jax.random.randint(jax.random.fold_in(k_e1, 1), (E,), 0, N)
    edge_index = jnp.stack([src1, dst1])
    src2 = jax.random.randint(k_e2, (E,), 0, N)
    dst2 = jax.random.randint(jax.random.fold_in(k_e2, 1), (E,), 0, N)
    edge_index_neighbor = jnp.stack([src2, dst2])

    batch = jnp.concatenate([jnp.zeros(N // 2, jnp.int32), jnp.ones(N - N // 2, jnp.int32)])

    params = init_params(k_param, gcn_layers_dim)
    packed = pack_params(params)          # hoisted: pack once, reuse across forwards

    out = gat_block_mix_forward(x, edge_index, edge_index_neighbor, batch, G,
                                packed, fout_last=gcn_layers_dim[3])
    out = jax.block_until_ready(out)

    ref = reference_forward(x, edge_index, edge_index_neighbor, batch, G, params)
    assert out.shape == (G, gcn_layers_dim[3]), out.shape
    assert bool(jnp.all(jnp.isfinite(out)))
    assert bool(jnp.allclose(out, ref, atol=5e-2, rtol=5e-2)), \
        float(jnp.max(jnp.abs(out - ref)))
    print("KERNEL_OK")
</pallas_src>

<mosaic_0001>
module attributes {stable_mosaic.version = 11 : i64} {
  func.func @kernel(%arg0: i32, %arg1: memref<1x16x128xbf16, #tpu.memory_space<vmem>>, %arg2: memref<1x16x16xf32, #tpu.memory_space<vmem>>, %arg3: memref<1x16x16xf32, #tpu.memory_space<vmem>>, %arg4: memref<1x8x16xf32, #tpu.memory_space<vmem>>, %arg5: memref<128x768xbf16, #tpu.memory_space<vmem>>, %arg6: memref<2x128x384xbf16, #tpu.memory_space<vmem>>, %arg7: memref<3x1x128xf32, #tpu.memory_space<vmem>>, %arg8: memref<2x128x384xbf16, #tpu.memory_space<vmem>>, %arg9: memref<3x1x128xf32, #tpu.memory_space<vmem>>, %arg10: memref<256x128xbf16, #tpu.memory_space<vmem>>, %arg11: memref<1x128xf32, #tpu.memory_space<vmem>>, %arg12: memref<1x8x128xf32, #tpu.memory_space<vmem>>) attributes {dimension_semantics = [#tpu.dimension_semantics<parallel>], iteration_bounds = array<i64: 1>, scalar_prefetch = 0 : i64, scratch_operands = 0 : i64, tpu.core_type = #tpu.core_type<tc>, window_params = [{transform_indices = @transform_0, window_bounds = array<i64: 1, 16, 128>}, {transform_indices = @transform_1, window_bounds = array<i64: 1, 16, 16>}, {transform_indices = @transform_2, window_bounds = array<i64: 1, 16, 16>}, {transform_indices = @transform_3, window_bounds = array<i64: 1, 8, 16>}, {pipeline_mode = #tpu.pipeline_mode<synchronous>, transform_indices = @transform_4, window_bounds = array<i64: 128, 768>}, {pipeline_mode = #tpu.pipeline_mode<synchronous>, transform_indices = @transform_5, window_bounds = array<i64: 2, 128, 384>}, {pipeline_mode = #tpu.pipeline_mode<synchronous>, transform_indices = @transform_6, window_bounds = array<i64: 3, 1, 128>}, {pipeline_mode = #tpu.pipeline_mode<synchronous>, transform_indices = @transform_7, window_bounds = array<i64: 2, 128, 384>}, {pipeline_mode = #tpu.pipeline_mode<synchronous>, transform_indices = @transform_8, window_bounds = array<i64: 3, 1, 128>}, {pipeline_mode = #tpu.pipeline_mode<synchronous>, transform_indices = @transform_9, window_bounds = array<i64: 256, 128>}, {pipeline_mode = #tpu.pipeline_mode<synchronous>, transform_indices = @transform_10, window_bounds = array<i64: 1, 128>}, {transform_indices = @transform_11, window_bounds = array<i64: 1, 8, 128>}]} {
    %c0 = arith.constant 0 : index
    %c0_0 = arith.constant 0 : index
    %c0_1 = arith.constant 0 : index
    %0 = vector.load %arg2[%c0, %c0_0, %c0_1] : memref<1x16x16xf32, #tpu.memory_space<vmem>>, vector<1x16x16xf32>
    %1 = vector.shape_cast %0 : vector<1x16x16xf32> to vector<16x16xf32>
    %c0_2 = arith.constant 0 : index
    %c0_3 = arith.constant 0 : index
    %c0_4 = arith.constant 0 : index
    %2 = vector.load %arg3[%c0_2, %c0_3, %c0_4] : memref<1x16x16xf32, #tpu.memory_space<vmem>>, vector<1x16x16xf32>
    %3 = vector.shape_cast %2 : vector<1x16x16xf32> to vector<16x16xf32>
    %c0_5 = arith.constant 0 : index
    %c0_6 = arith.constant 0 : index
    %c0_7 = arith.constant 0 : index
    %4 = vector.load %arg1[%c0_5, %c0_6, %c0_7] : memref<1x16x128xbf16, #tpu.memory_space<vmem>>, vector<1x16x128xbf16>
    %5 = vector.shape_cast %4 : vector<1x16x128xbf16> to vector<16x128xbf16>
    %c0_8 = arith.constant 0 : index
    %c0_9 = arith.constant 0 : index
    %6 = vector.load %arg5[%c0_8, %c0_9] : memref<128x768xbf16, #tpu.memory_space<vmem>>, vector<128x768xbf16>
    %cst = arith.constant dense<0.000000e+00> : vector<16x768xf32>
    %7 = tpu.matmul %5, %6, %cst {dimension_numbers = #tpu.dot_dimension_numbers<[1], [0], [0], [1], [0, 0, 1, 1], [], []>} : vector<16x128xbf16>, vector<128x768xbf16>, vector<16x768xf32> -> vector<16x768xf32>
    %8 = vector.extract_strided_slice %7 {offsets = [0, 0], sizes = [16, 128], strides = [1, 1]} : vector<16x768xf32> to vector<16x128xf32>
    %9 = vector.extract_strided_slice %7 {offsets = [0, 256], sizes = [16, 16], strides = [1, 1]} : vector<16x768xf32> to vector<16x16xf32>
    %10 = vector.extract_strided_slice %7 {offsets = [0, 128], sizes = [16, 128], strides = [1, 1]} : vector<16x768xf32> to vector<16x128xf32>
    %c0_10 = arith.constant 0 : index
    %c0_11 = arith.constant 0 : index
    %c0_12 = arith.constant 0 : index
    %11 = vector.load %arg7[%c0_10, %c0_11, %c0_12] : memref<3x1x128xf32, #tpu.memory_space<vmem>>, vector<1x1x128xf32>
    %12 = vector.shape_cast %11 : vector<1x1x128xf32> to vector<1x128xf32>
    %13 = tpu.transpose %10, [1, 0] : vector<16x128xf32> -> vector<128x16xf32>
    %14 = vector.extract_strided_slice %13 {offsets = [0, 0], sizes = [1, 16], strides = [1, 1]} : vector<128x16xf32> to vector<1x16xf32>
    %15 = vector.broadcast %14 : vector<1x16xf32> to vector<16x16xf32>
    %16 = arith.addf %9, %15 : vector<16x16xf32>
    %cst_13 = arith.constant 2.000000e-01 : f32
    %17 = vector.broadcast %cst_13 : f32 to vector<16x16xf32>
    %18 = arith.mulf %17, %16 : vector<16x16xf32>
    %19 = arith.maximumf %16, %18 : vector<16x16xf32>
    %20 = arith.addf %19, %1 : vector<16x16xf32>
    %cst_14 = arith.constant dense<0xFF800000> : vector<16xf32>
    %21 = vector.multi_reduction <maximumf>, %20, %cst_14 [1] : vector<16x16xf32> to vector<16xf32>
    %22 = vector.shape_cast %21 : vector<16xf32> to vector<16x1xf32>
    %23 = vector.broadcast %22 : vector<16x1xf32> to vector<16x16xf32>
    %24 = arith.subf %20, %23 : vector<16x16xf32>
    %25 = math.exp %24 : vector<16x16xf32>
    %cst_15 = arith.constant dense<0.000000e+00> : vector<16xf32>
    %26 = vector.multi_reduction <add>, %25, %cst_15 [1] : vector<16x16xf32> to vector<16xf32>
    %27 = vector.shape_cast %26 : vector<16xf32> to vector<16x1xf32>
    %28 = tpu.reciprocal %27 {approx = true} : vector<16x1xf32> -> vector<16x1xf32>
    %29 = vector.broadcast %28 : vector<16x1xf32> to vector<16x16xf32>
    %30 = arith.mulf %25, %29 : vector<16x16xf32>
    %31 = arith.truncf %30 : vector<16x16xf32> to vector<16x16xbf16>
    %32 = arith.truncf %8 : vector<16x128xf32> to vector<16x128xbf16>
    %cst_16 = arith.constant dense<0.000000e+00> : vector<16x128xf32>
    %33 = tpu.matmul %31, %32, %cst_16 {dimension_numbers = #tpu.dot_dimension_numbers<[1], [0], [0], [1], [0, 0, 1, 1], [], []>} : vector<16x16xbf16>, vector<16x128xbf16>, vector<16x128xf32> -> vector<16x128xf32>
    %34 = vector.broadcast %12 : vector<1x128xf32> to vector<16x128xf32>
    %35 = arith.addf %33, %34 : vector<16x128xf32>
    %36 = vector.extract_strided_slice %7 {offsets = [0, 384], sizes = [16, 128], strides = [1, 1]} : vector<16x768xf32> to vector<16x128xf32>
    %37 = vector.extract_strided_slice %7 {offsets = [0, 640], sizes = [16, 16], strides = [1, 1]} : vector<16x768xf32> to vector<16x16xf32>
    %38 = vector.extract_strided_slice %7 {offsets = [0, 512], sizes = [16, 128], strides = [1, 1]} : vector<16x768xf32> to vector<16x128xf32>
    %c0_17 = arith.constant 0 : index
    %c0_18 = arith.constant 0 : index
    %c0_19 = arith.constant 0 : index
    %39 = vector.load %arg9[%c0_17, %c0_18, %c0_19] : memref<3x1x128xf32, #tpu.memory_space<vmem>>, vector<1x1x128xf32>
    %40 = vector.shape_cast %39 : vector<1x1x128xf32> to vector<1x128xf32>
    %41 = tpu.transpose %38, [1, 0] : vector<16x128xf32> -> vector<128x16xf32>
    %42 = vector.extract_strided_slice %41 {offsets = [0, 0], sizes = [1, 16], strides = [1, 1]} : vector<128x16xf32> to vector<1x16xf32>
    %43 = vector.broadcast %42 : vector<1x16xf32> to vector<16x16xf32>
    %44 = arith.addf %37, %43 : vector<16x16xf32>
    %cst_20 = arith.constant 2.000000e-01 : f32
    %45 = vector.broadcast %cst_20 : f32 to vector<16x16xf32>
    %46 = arith.mulf %45, %44 : vector<16x16xf32>
    %47 = arith.maximumf %44, %46 : vector<16x16xf32>
    %48 = arith.addf %47, %3 : vector<16x16xf32>
    %cst_21 = arith.constant dense<0xFF800000> : vector<16xf32>
    %49 = vector.multi_reduction <maximumf>, %48, %cst_21 [1] : vector<16x16xf32> to vector<16xf32>
    %50 = vector.shape_cast %49 : vector<16xf32> to vector<16x1xf32>
    %51 = vector.broadcast %50 : vector<16x1xf32> to vector<16x16xf32>
    %52 = arith.subf %48, %51 : vector<16x16xf32>
    %53 = math.exp %52 : vector<16x16xf32>
    %cst_22 = arith.constant dense<0.000000e+00> : vector<16xf32>
    %54 = vector.multi_reduction <add>, %53, %cst_22 [1] : vector<16x16xf32> to vector<16xf32>
    %55 = vector.shape_cast %54 : vector<16xf32> to vector<16x1xf32>
    %56 = tpu.reciprocal %55 {approx = true} : vector<16x1xf32> -> vector<16x1xf32>
    %57 = vector.broadcast %56 : vector<16x1xf32> to vector<16x16xf32>
    %58 = arith.mulf %53, %57 : vector<16x16xf32>
    %59 = arith.truncf %58 : vector<16x16xf32> to vector<16x16xbf16>
    %60 = arith.truncf %36 : vector<16x128xf32> to vector<16x128xbf16>
    %cst_23 = arith.constant dense<0.000000e+00> : vector<16x128xf32>
    %61 = tpu.matmul %59, %60, %cst_23 {dimension_numbers = #tpu.dot_dimension_numbers<[1], [0], [0], [1], [0, 0, 1, 1], [], []>} : vector<16x16xbf16>, vector<16x128xbf16>, vector<16x128xf32> -> vector<16x128xf32>
    %62 = vector.broadcast %40 : vector<1x128xf32> to vector<16x128xf32>
    %63 = arith.addf %61, %62 : vector<16x128xf32>
    %64 = arith.truncf %35 : vector<16x128xf32> to vector<16x128xbf16>
    %65 = arith.truncf %63 : vector<16x128xf32> to vector<16x128xbf16>
    %c0_24 = arith.constant 0 : index
    %c0_25 = arith.constant 0 : index
    %c0_26 = arith.constant 0 : index
    %66 = vector.load %arg6[%c0_24, %c0_25, %c0_26] : memref<2x128x384xbf16, #tpu.memory_space<vmem>>, vector<1x128x384xbf16>
    %67 = vector.shape_cast %66 : vector<1x128x384xbf16> to vector<128x384xbf16>
    %cst_27 = arith.constant dense<0.000000e+00> : vector<16x384xf32>
    %68 = tpu.matmul %64, %67, %cst_27 {dimension_numbers = #tpu.dot_dimension_numbers<[1], [0], [0], [1], [0, 0, 1, 1], [], []>} : vector<16x128xbf16>, vector<128x384xbf16>, vector<16x384xf32> -> vector<16x384xf32>
    %c0_28 = arith.constant 0 : index
    %c0_29 = arith.constant 0 : index
    %c0_30 = arith.constant 0 : index
    %69 = vector.load %arg8[%c0_28, %c0_29, %c0_30] : memref<2x128x384xbf16, #tpu.memory_space<vmem>>, vector<1x128x384xbf16>
    %70 = vector.shape_cast %69 : vector<1x128x384xbf16> to vector<128x384xbf16>
    %cst_31 = arith.constant dense<0.000000e+00> : vector<16x384xf32>
    %71 = tpu.matmul %65, %70, %cst_31 {dimension_numbers = #tpu.dot_dimension_numbers<[1], [0], [0], [1], [0, 0, 1, 1], [], []>} : vector<16x128xbf16>, vector<128x384xbf16>, vector<16x384xf32> -> vector<16x384xf32>
    %72 = vector.extract_strided_slice %68 {offsets = [0, 0], sizes = [16, 128], strides = [1, 1]} : vector<16x384xf32> to vector<16x128xf32>
    %73 = vector.extract_strided_slice %68 {offsets = [0, 256], sizes = [16, 16], strides = [1, 1]} : vector<16x384xf32> to vector<16x16xf32>
    %74 = vector.extract_strided_slice %68 {offsets = [0, 128], sizes = [16, 128], strides = [1, 1]} : vector<16x384xf32> to vector<16x128xf32>
    %c1 = arith.constant 1 : index
    %c0_32 = arith.constant 0 : index
    %c0_33 = arith.constant 0 : index
    %75 = vector.load %arg7[%c1, %c0_32, %c0_33] : memref<3x1x128xf32, #tpu.memory_space<vmem>>, vector<1x1x128xf32>
    %76 = vector.shape_cast %75 : vector<1x1x128xf32> to vector<1x128xf32>
    %77 = tpu.transpose %74, [1, 0] : vector<16x128xf32> -> vector<128x16xf32>
    %78 = vector.extract_strided_slice %77 {offsets = [0, 0], sizes = [1, 16], strides = [1, 1]} : vector<128x16xf32> to vector<1x16xf32>
    %79 = vector.broadcast %78 : vector<1x16xf32> to vector<16x16xf32>
    %80 = arith.addf %73, %79 : vector<16x16xf32>
    %cst_34 = arith.constant 2.000000e-01 : f32
    %81 = vector.broadcast %cst_34 : f32 to vector<16x16xf32>
    %82 = arith.mulf %81, %80 : vector<16x16xf32>
    %83 = arith.maximumf %80, %82 : vector<16x16xf32>
    %84 = arith.addf %83, %1 : vector<16x16xf32>
    %cst_35 = arith.constant dense<0xFF800000> : vector<16xf32>
    %85 = vector.multi_reduction <maximumf>, %84, %cst_35 [1] : vector<16x16xf32> to vector<16xf32>
    %86 = vector.shape_cast %85 : vector<16xf32> to vector<16x1xf32>
    %87 = vector.broadcast %86 : vector<16x1xf32> to vector<16x16xf32>
    %88 = arith.subf %84, %87 : vector<16x16xf32>
    %89 = math.exp %88 : vector<16x16xf32>
    %cst_36 = arith.constant dense<0.000000e+00> : vector<16xf32>
    %90 = vector.multi_reduction <add>, %89, %cst_36 [1] : vector<16x16xf32> to vector<16xf32>
    %91 = vector.shape_cast %90 : vector<16xf32> to vector<16x1xf32>
    %92 = tpu.reciprocal %91 {approx = true} : vector<16x1xf32> -> vector<16x1xf32>
    %93 = vector.broadcast %92 : vector<16x1xf32> to vector<16x16xf32>
    %94 = arith.mulf %89, %93 : vector<16x16xf32>
    %95 = arith.truncf %94 : vector<16x16xf32> to vector<16x16xbf16>
    %96 = arith.truncf %72 : vector<16x128xf32> to vector<16x128xbf16>
    %cst_37 = arith.constant dense<0.000000e+00> : vector<16x128xf32>
    %97 = tpu.matmul %95, %96, %cst_37 {dimension_numbers = #tpu.dot_dimension_numbers<[1], [0], [0], [1], [0, 0, 1, 1], [], []>} : vector<16x16xbf16>, vector<16x128xbf16>, vector<16x128xf32> -> vector<16x128xf32>
    %98 = vector.broadcast %76 : vector<1x128xf32> to vector<16x128xf32>
    %99 = arith.addf %97, %98 : vector<16x128xf32>
    %cst_38 = arith.constant 0.000000e+00 : f32
    %100 = vector.broadcast %cst_38 : f32 to vector<16x128xf32>
    %101 = arith.maximumf %99, %100 : vector<16x128xf32>
    %102 = vector.extract_strided_slice %71 {offsets = [0, 0], sizes = [16, 128], strides = [1, 1]} : vector<16x384xf32> to vector<16x128xf32>
    %103 = vector.extract_strided_slice %71 {offsets = [0, 256], sizes = [16, 16], strides = [1, 1]} : vector<16x384xf32> to vector<16x16xf32>
    %104 = vector.extract_strided_slice %71 {offsets = [0, 128], sizes = [16, 128], strides = [1, 1]} : vector<16x384xf32> to vector<16x128xf32>
    %c1_39 = arith.constant 1 : index
    %c0_40 = arith.constant 0 : index
    %c0_41 = arith.constant 0 : index
    %105 = vector.load %arg9[%c1_39, %c0_40, %c0_41] : memref<3x1x128xf32, #tpu.memory_space<vmem>>, vector<1x1x128xf32>
    %106 = vector.shape_cast %105 : vector<1x1x128xf32> to vector<1x128xf32>
    %107 = tpu.transpose %104, [1, 0] : vector<16x128xf32> -> vector<128x16xf32>
    %108 = vector.extract_strided_slice %107 {offsets = [0, 0], sizes = [1, 16], strides = [1, 1]} : vector<128x16xf32> to vector<1x16xf32>
    %109 = vector.broadcast %108 : vector<1x16xf32> to vector<16x16xf32>
    %110 = arith.addf %103, %109 : vector<16x16xf32>
    %cst_42 = arith.constant 2.000000e-01 : f32
    %111 = vector.broadcast %cst_42 : f32 to vector<16x16xf32>
    %112 = arith.mulf %111, %110 : vector<16x16xf32>
    %113 = arith.maximumf %110, %112 : vector<16x16xf32>
    %114 = arith.addf %113, %3 : vector<16x16xf32>
    %cst_43 = arith.constant dense<0xFF800000> : vector<16xf32>
    %115 = vector.multi_reduction <maximumf>, %114, %cst_43 [1] : vector<16x16xf32> to vector<16xf32>
    %116 = vector.shape_cast %115 : vector<16xf32> to vector<16x1xf32>
    %117 = vector.broadcast %116 : vector<16x1xf32> to vector<16x16xf32>
    %118 = arith.subf %114, %117 : vector<16x16xf32>
    %119 = math.exp %118 : vector<16x16xf32>
    %cst_44 = arith.constant dense<0.000000e+00> : vector<16xf32>
    %120 = vector.multi_reduction <add>, %119, %cst_44 [1] : vector<16x16xf32> to vector<16xf32>
    %121 = vector.shape_cast %120 : vector<16xf32> to vector<16x1xf32>
    %122 = tpu.reciprocal %121 {approx = true} : vector<16x1xf32> -> vector<16x1xf32>
    %123 = vector.broadcast %122 : vector<16x1xf32> to vector<16x16xf32>
    %124 = arith.mulf %119, %123 : vector<16x16xf32>
    %125 = arith.truncf %124 : vector<16x16xf32> to vector<16x16xbf16>
    %126 = arith.truncf %102 : vector<16x128xf32> to vector<16x128xbf16>
    %cst_45 = arith.constant dense<0.000000e+00> : vector<16x128xf32>
    %127 = tpu.matmul %125, %126, %cst_45 {dimension_numbers = #tpu.dot_dimension_numbers<[1], [0], [0], [1], [0, 0, 1, 1], [], []>} : vector<16x16xbf16>, vector<16x128xbf16>, vector<16x128xf32> -> vector<16x128xf32>
    %128 = vector.broadcast %106 : vector<1x128xf32> to vector<16x128xf32>
    %129 = arith.addf %127, %128 : vector<16x128xf32>
    %cst_46 = arith.constant 0.000000e+00 : f32
    %130 = vector.broadcast %cst_46 : f32 to vector<16x128xf32>
    %131 = arith.maximumf %129, %130 : vector<16x128xf32>
    %132 = arith.truncf %101 : vector<16x128xf32> to vector<16x128xbf16>
    %133 = arith.truncf %131 : vector<16x128xf32> to vector<16x128xbf16>
    %c1_47 = arith.constant 1 : index
    %c0_48 = arith.constant 0 : index
    %c0_49 = arith.constant 0 : index
    %134 = vector.load %arg6[%c1_47, %c0_48, %c0_49] : memref<2x128x384xbf16, #tpu.memory_space<vmem>>, vector<1x128x384xbf16>
    %135 = vector.shape_cast %134 : vector<1x128x384xbf16> to vector<128x384xbf16>
    %cst_50 = arith.constant dense<0.000000e+00> : vector<16x384xf32>
    %136 = tpu.matmul %132, %135, %cst_50 {dimension_numbers = #tpu.dot_dimension_numbers<[1], [0], [0], [1], [0, 0, 1, 1], [], []>} : vector<16x128xbf16>, vector<128x384xbf16>, vector<16x384xf32> -> vector<16x384xf32>
    %c1_51 = arith.constant 1 : index
    %c0_52 = arith.constant 0 : index
    %c0_53 = arith.constant 0 : index
    %137 = vector.load %arg8[%c1_51, %c0_52, %c0_53] : memref<2x128x384xbf16, #tpu.memory_space<vmem>>, vector<1x128x384xbf16>
    %138 = vector.shape_cast %137 : vector<1x128x384xbf16> to vector<128x384xbf16>
    %cst_54 = arith.constant dense<0.000000e+00> : vector<16x384xf32>
    %139 = tpu.matmul %133, %138, %cst_54 {dimension_numbers = #tpu.dot_dimension_numbers<[1], [0], [0], [1], [0, 0, 1, 1], [], []>} : vector<16x128xbf16>, vector<128x384xbf16>, vector<16x384xf32> -> vector<16x384xf32>
    %140 = vector.extract_strided_slice %136 {offsets = [0, 0], sizes = [16, 128], strides = [1, 1]} : vector<16x384xf32> to vector<16x128xf32>
    %141 = vector.extract_strided_slice %136 {offsets = [0, 256], sizes = [16, 16], strides = [1, 1]} : vector<16x384xf32> to vector<16x16xf32>
    %142 = vector.extract_strided_slice %136 {offsets = [0, 128], sizes = [16, 128], strides = [1, 1]} : vector<16x384xf32> to vector<16x128xf32>
    %c2 = arith.constant 2 : index
    %c0_55 = arith.constant 0 : index
    %c0_56 = arith.constant 0 : index
    %143 = vector.load %arg7[%c2, %c0_55, %c0_56] : memref<3x1x128xf32, #tpu.memory_space<vmem>>, vector<1x1x128xf32>
    %144 = vector.shape_cast %143 : vector<1x1x128xf32> to vector<1x128xf32>
    %145 = tpu.transpose %142, [1, 0] : vector<16x128xf32> -> vector<128x16xf32>
    %146 = vector.extract_strided_slice %145 {offsets = [0, 0], sizes = [1, 16], strides = [1, 1]} : vector<128x16xf32> to vector<1x16xf32>
    %147 = vector.broadcast %146 : vector<1x16xf32> to vector<16x16xf32>
    %148 = arith.addf %141, %147 : vector<16x16xf32>
    %cst_57 = arith.constant 2.000000e-01 : f32
    %149 = vector.broadcast %cst_57 : f32 to vector<16x16xf32>
    %150 = arith.mulf %149, %148 : vector<16x16xf32>
    %151 = arith.maximumf %148, %150 : vector<16x16xf32>
    %152 = arith.addf %151, %1 : vector<16x16xf32>
    %cst_58 = arith.constant dense<0xFF800000> : vector<16xf32>
    %153 = vector.multi_reduction <maximumf>, %152, %cst_58 [1] : vector<16x16xf32> to vector<16xf32>
    %154 = vector.shape_cast %153 : vector<16xf32> to vector<16x1xf32>
    %155 = vector.broadcast %154 : vector<16x1xf32> to vector<16x16xf32>
    %156 = arith.subf %152, %155 : vector<16x16xf32>
    %157 = math.exp %156 : vector<16x16xf32>
    %cst_59 = arith.constant dense<0.000000e+00> : vector<16xf32>
    %158 = vector.multi_reduction <add>, %157, %cst_59 [1] : vector<16x16xf32> to vector<16xf32>
    %159 = vector.shape_cast %158 : vector<16xf32> to vector<16x1xf32>
    %160 = tpu.reciprocal %159 {approx = true} : vector<16x1xf32> -> vector<16x1xf32>
    %161 = vector.broadcast %160 : vector<16x1xf32> to vector<16x16xf32>
    %162 = arith.mulf %157, %161 : vector<16x16xf32>
    %163 = arith.truncf %162 : vector<16x16xf32> to vector<16x16xbf16>
    %164 = arith.truncf %140 : vector<16x128xf32> to vector<16x128xbf16>
    %cst_60 = arith.constant dense<0.000000e+00> : vector<16x128xf32>
    %165 = tpu.matmul %163, %164, %cst_60 {dimension_numbers = #tpu.dot_dimension_numbers<[1], [0], [0], [1], [0, 0, 1, 1], [], []>} : vector<16x16xbf16>, vector<16x128xbf16>, vector<16x128xf32> -> vector<16x128xf32>
    %166 = vector.broadcast %144 : vector<1x128xf32> to vector<16x128xf32>
    %167 = arith.addf %165, %166 : vector<16x128xf32>
    %cst_61 = arith.constant 0.000000e+00 : f32
    %168 = vector.broadcast %cst_61 : f32 to vector<16x128xf32>
    %169 = arith.maximumf %167, %168 : vector<16x128xf32>
    %170 = vector.extract_strided_slice %139 {offsets = [0, 0], sizes = [16, 128], strides = [1, 1]} : vector<16x384xf32> to vector<16x128xf32>
    %171 = vector.extract_strided_slice %139 {offsets = [0, 256], sizes = [16, 16], strides = [1, 1]} : vector<16x384xf32> to vector<16x16xf32>
    %172 = vector.extract_strided_slice %139 {offsets = [0, 128], sizes = [16, 128], strides = [1, 1]} : vector<16x384xf32> to vector<16x128xf32>
    %c2_62 = arith.constant 2 : index
    %c0_63 = arith.constant 0 : index
    %c0_64 = arith.constant 0 : index
    %173 = vector.load %arg9[%c2_62, %c0_63, %c0_64] : memref<3x1x128xf32, #tpu.memory_space<vmem>>, vector<1x1x128xf32>
    %174 = vector.shape_cast %173 : vector<1x1x128xf32> to vector<1x128xf32>
    %175 = tpu.transpose %172, [1, 0] : vector<16x128xf32> -> vector<128x16xf32>
    %176 = vector.extract_strided_slice %175 {offsets = [0, 0], sizes = [1, 16], strides = [1, 1]} : vector<128x16xf32> to vector<1x16xf32>
    %177 = vector.broadcast %176 : vector<1x16xf32> to vector<16x16xf32>
    %178 = arith.addf %171, %177 : vector<16x16xf32>
    %cst_65 = arith.constant 2.000000e-01 : f32
    %179 = vector.broadcast %cst_65 : f32 to vector<16x16xf32>
    %180 = arith.mulf %179, %178 : vector<16x16xf32>
    %181 = arith.maximumf %178, %180 : vector<16x16xf32>
    %182 = arith.addf %181, %3 : vector<16x16xf32>
    %cst_66 = arith.constant dense<0xFF800000> : vector<16xf32>
    %183 = vector.multi_reduction <maximumf>, %182, %cst_66 [1] : vector<16x16xf32> to vector<16xf32>
    %184 = vector.shape_cast %183 : vector<16xf32> to vector<16x1xf32>
    %185 = vector.broadcast %184 : vector<16x1xf32> to vector<16x16xf32>
    %186 = arith.subf %182, %185 : vector<16x16xf32>
    %187 = math.exp %186 : vector<16x16xf32>
    %cst_67 = arith.constant dense<0.000000e+00> : vector<16xf32>
    %188 = vector.multi_reduction <add>, %187, %cst_67 [1] : vector<16x16xf32> to vector<16xf32>
    %189 = vector.shape_cast %188 : vector<16xf32> to vector<16x1xf32>
    %190 = tpu.reciprocal %189 {approx = true} : vector<16x1xf32> -> vector<16x1xf32>
    %191 = vector.broadcast %190 : vector<16x1xf32> to vector<16x16xf32>
    %192 = arith.mulf %187, %191 : vector<16x16xf32>
    %193 = arith.truncf %192 : vector<16x16xf32> to vector<16x16xbf16>
    %194 = arith.truncf %170 : vector<16x128xf32> to vector<16x128xbf16>
    %cst_68 = arith.constant dense<0.000000e+00> : vector<16x128xf32>
    %195 = tpu.matmul %193, %194, %cst_68 {dimension_numbers = #tpu.dot_dimension_numbers<[1], [0], [0], [1], [0, 0, 1, 1], [], []>} : vector<16x16xbf16>, vector<16x128xbf16>, vector<16x128xf32> -> vector<16x128xf32>
    %196 = vector.broadcast %174 : vector<1x128xf32> to vector<16x128xf32>
    %197 = arith.addf %195, %196 : vector<16x128xf32>
    %cst_69 = arith.constant 0.000000e+00 : f32
    %198 = vector.broadcast %cst_69 : f32 to vector<16x128xf32>
    %199 = arith.maximumf %197, %198 : vector<16x128xf32>
    %200 = arith.truncf %169 : vector<16x128xf32> to vector<16x128xbf16>
    %201 = arith.truncf %199 : vector<16x128xf32> to vector<16x128xbf16>
    %202 = tpu.concatenate %200, %201 in 1 : vector<16x128xbf16>, vector<16x128xbf16> -> vector<16x256xbf16>
    %c0_70 = arith.constant 0 : index
    %c0_71 = arith.constant 0 : index
    %203 = vector.load %arg10[%c0_70, %c0_71] : memref<256x128xbf16, #tpu.memory_space<vmem>>, vector<256x128xbf16>
    %cst_72 = arith.constant dense<0.000000e+00> : vector<16x128xf32>
    %204 = tpu.matmul %202, %203, %cst_72 {dimension_numbers = #tpu.dot_dimension_numbers<[1], [0], [0], [1], [0, 0, 1, 1], [], []>} : vector<16x256xbf16>, vector<256x128xbf16>, vector<16x128xf32> -> vector<16x128xf32>
    %c0_73 = arith.constant 0 : index
    %c0_74 = arith.constant 0 : index
    %205 = vector.load %arg11[%c0_73, %c0_74] : memref<1x128xf32, #tpu.memory_space<vmem>>, vector<1x128xf32>
    %206 = vector.broadcast %205 : vector<1x128xf32> to vector<16x128xf32>
    %207 = arith.addf %204, %206 : vector<16x128xf32>
    %c0_75 = arith.constant 0 : index
    %c0_76 = arith.constant 0 : index
    %c0_77 = arith.constant 0 : index
    %208 = vector.load %arg4[%c0_75, %c0_76, %c0_77] : memref<1x8x16xf32, #tpu.memory_space<vmem>>, vector<1x8x16xf32>
    %209 = vector.shape_cast %208 : vector<1x8x16xf32> to vector<8x16xf32>
    %cst_78 = arith.constant dense<0.000000e+00> : vector<8x128xf32>
    %210 = tpu.matmul %209, %207, %cst_78 {dimension_numbers = #tpu.dot_dimension_numbers<[1], [0], [0], [1], [0, 0, 1, 1], [], []>} : vector<8x16xf32>, vector<16x128xf32>, vector<8x128xf32> -> vector<8x128xf32>
    %c0_79 = arith.constant 0 : index
    %c0_80 = arith.constant 0 : index
    %c0_81 = arith.constant 0 : index
    %211 = vector.load %arg12[%c0_79, %c0_80, %c0_81] : memref<1x8x128xf32, #tpu.memory_space<vmem>>, vector<1x8x128xf32>
    %212 = vector.shape_cast %211 : vector<1x8x128xf32> to vector<8x128xf32>
    %213 = vector.shape_cast %210 : vector<8x128xf32> to vector<1x8x128xf32>
    tpu.vector_store %arg12[%c0_79, %c0_80, %c0_81], %213 {strides = array<i32>} : memref<1x8x128xf32, #tpu.memory_space<vmem>>, vector<1x8x128xf32>,
    return
  }
  func.func @transform_0(%arg0: i32) -> (i32, i32, i32) {
    %c0_i32 = arith.constant 0 : i32
    %c0_i32_0 = arith.constant 0 : i32
    %c0_i32_1 = arith.constant 0 : i32
    return %arg0, %c0_i32, %c0_i32_0 : i32, i32, i32
  }
  func.func @transform_1(%arg0: i32) -> (i32, i32, i32) {
    %c0_i32 = arith.constant 0 : i32
    %c0_i32_0 = arith.constant 0 : i32
    %c0_i32_1 = arith.constant 0 : i32
    return %arg0, %c0_i32, %c0_i32_0 : i32, i32, i32
  }
  func.func @transform_2(%arg0: i32) -> (i32, i32, i32) {
    %c0_i32 = arith.constant 0 : i32
    %c0_i32_0 = arith.constant 0 : i32
    %c0_i32_1 = arith.constant 0 : i32
    return %arg0, %c0_i32, %c0_i32_0 : i32, i32, i32
  }
  func.func @transform_3(%arg0: i32) -> (i32, i32, i32) {
    %c0_i32 = arith.constant 0 : i32
    %c0_i32_0 = arith.constant 0 : i32
    %c0_i32_1 = arith.constant 0 : i32
    return %arg0, %c0_i32, %c0_i32_0 : i32, i32, i32
  }
  func.func @transform_4(%arg0: i32) -> (i32, i32) {
    %c0_i32 = arith.constant 0 : i32
    %c0_i32_0 = arith.constant 0 : i32
    %c0_i32_1 = arith.constant 0 : i32
    return %c0_i32, %c0_i32_0 : i32, i32
  }
  func.func @transform_5(%arg0: i32) -> (i32, i32, i32) {
    %c0_i32 = arith.constant 0 : i32
    %c0_i32_0 = arith.constant 0 : i32
    %c0_i32_1 = arith.constant 0 : i32
    %c0_i32_2 = arith.constant 0 : i32
    return %c0_i32, %c0_i32_0, %c0_i32_1 : i32, i32, i32
  }
  func.func @transform_6(%arg0: i32) -> (i32, i32, i32) {
    %c0_i32 = arith.constant 0 : i32
    %c0_i32_0 = arith.constant 0 : i32
    %c0_i32_1 = arith.constant 0 : i32
    %c0_i32_2 = arith.constant 0 : i32
    return %c0_i32, %c0_i32_0, %c0_i32_1 : i32, i32, i32
  }
  func.func @transform_7(%arg0: i32) -> (i32, i32, i32) {
    %c0_i32 = arith.constant 0 : i32
    %c0_i32_0 = arith.constant 0 : i32
    %c0_i32_1 = arith.constant 0 : i32
    %c0_i32_2 = arith.constant 0 : i32
    return %c0_i32, %c0_i32_0, %c0_i32_1 : i32, i32, i32
  }
  func.func @transform_8(%arg0: i32) -> (i32, i32, i32) {
    %c0_i32 = arith.constant 0 : i32
    %c0_i32_0 = arith.constant 0 : i32
    %c0_i32_1 = arith.constant 0 : i32
    %c0_i32_2 = arith.constant 0 : i32
    return %c0_i32, %c0_i32_0, %c0_i32_1 : i32, i32, i32
  }
  func.func @transform_9(%arg0: i32) -> (i32, i32) {
    %c0_i32 = arith.constant 0 : i32
    %c0_i32_0 = arith.constant 0 : i32
    %c0_i32_1 = arith.constant 0 : i32
    return %c0_i32, %c0_i32_0 : i32, i32
  }
  func.func @transform_10(%arg0: i32) -> (i32, i32) {
    %c0_i32 = arith.constant 0 : i32
    %c0_i32_0 = arith.constant 0 : i32
    %c0_i32_1 = arith.constant 0 : i32
    return %c0_i32, %c0_i32_0 : i32, i32
  }
  func.func @transform_11(%arg0: i32) -> (i32, i32, i32) {
    %c0_i32 = arith.constant 0 : i32
    %c0_i32_0 = arith.constant 0 : i32
    %c0_i32_1 = arith.constant 0 : i32
    return %arg0, %c0_i32, %c0_i32_0 : i32, i32, i32
  }
}

</mosaic_0001>

<bundles_post_ra>
// kernel: tpu_custom_call.1
= control target key start
LH: loop header
LB: loop body
LE: loop exit
PB: predicated region body
PF: predicated region fallthrough
CT: control target
= control target key end

     0   :  { %16 = vsyncpa [#allocation3], 0  ;;  %s3447_s0 = inlined_call_operand.hbm [shape: bf16[1,16,128], index: 0, kind: input, shape index: {}]   ;;  %s3448_s1 = inlined_call_operand.hbm [shape: f32[1,16,16], index: 1, kind: input, shape index: {}]   ;;  %s3449_s2 = inlined_call_operand.hbm [shape: f32[1,16,16], index: 2, kind: input, shape index: {}]   ;;  %s3450_s3 = inlined_call_operand.hbm [shape: f32[1,8,16], index: 3, kind: input, shape index: {}]   ;;  %s3451_s4 = inlined_call_operand.hbm [shape: bf16[128,768], index: 4, kind: input, shape index: {}]   ;;  %s3452_s5 = inlined_call_operand.hbm [shape: bf16[2,128,384], index: 5, kind: input, shape index: {}]   ;;  %s3453_s6 = inlined_call_operand.vmem [shape: f32[3,1,128], index: 6, kind: input, shape index: {}]   ;;  %s3454_s7 = inlined_call_operand.hbm [shape: bf16[2,128,384], index: 7, kind: input, shape index: {}]   ;;  %s3455_s8 = inlined_call_operand.vmem [shape: f32[3,1,128], index: 8, kind: input, shape index: {}]   ;;  %s3456_s9 = inlined_call_operand.hbm [shape: bf16[256,128], index: 9, kind: input, shape index: {}]   ;;  %s3457_s10 = inlined_call_operand.vmem [shape: f32[1,128], index: 10, kind: input, shape index: {}]   ;;  %s3458_s11 = inlined_call_operand.hbm [shape: f32[1,8,128], index: 11, kind: output, shape index: {}]  }
   0x1   :  { %17 = vsyncpa [#allocation6], 0 }
   0x2   :  { %18 = vsyncpa [#allocation9], 0 }
   0x3   :  { %19 = vsyncpa [#allocation12], 0 }
   0x4   :  { %20 = vsyncpa [#allocation15], 0  ;;  %s39_s19 = sshll.u32 %s3448_s1, 4  ;;  %s40_s19 = int_to_ptr.hbm [resolvable:$true] %s39_s19 }
   0x5   :  { %21 = vsyncpa [#allocation4], 0  ;;  %s3233_s20 = smov [#allocation5]   ;;  %s66_s24 = sshll.u32 %s3450_s3, 4  ;;  %s67_s24 = int_to_ptr.hbm [resolvable:$true] %s66_s24 }
   0x6   :  { %s41_s21 = sshll.u32 %s3233_s20, 4  ;;  %s3234_s25 = smov 128   ;;  %s42_s21 = int_to_ptr.vmem [resolvable:$true] %s41_s21 }
   0x7   :  { %s3235_s26 = smov 8   ;;  %s3236_s27 = smov [#allocation8]  }
   0x8   :  { %47 = dma.hbm_to_vmem [thread:$0]  %s40_s19, 256, %s42_s21, [#allocation6], %s3234_s25, %s3234_s25, %s3235_s26  }
   0x9   :  { %s68_s28 = sshll.u32 %s3236_s27, 4  ;;  %s89_s30 = sshll.u32 %s3452_s5, 4  ;;  %s69_s28 = int_to_ptr.vmem [resolvable:$true] %s68_s28  ;;  %s90_s30 = int_to_ptr.hbm [resolvable:$true] %s89_s30 }
   0xa   :  { %71 = dma.hbm_to_vmem [thread:$0]  %s67_s24, 128, %s69_s28, [#allocation9]  }
   0xb   :  { %s3237_s12 = smov [#allocation11]   ;;  %s26_s15 = sshll.u32 %s3447_s0, 4  ;;  %s27_s15 = int_to_ptr.hbm [resolvable:$true] %s26_s15 }
   0xc   :  { %s91_s13 = sshll.u32 %s3237_s12, 4  ;;  %s3238_s16 = smov 192   ;;  %s92_s13 = int_to_ptr.vmem [resolvable:$true] %s91_s13 }
   0xd   :  { %s3239_s17 = smov 12   ;;  %s3240_s18 = smov [#allocation2]  }
   0xe   :  { %97 = dma.hbm_to_vmem [thread:$0]  %s90_s30, 6144, %s92_s13, [#allocation12], %s3238_s16, %s3238_s16, %s3239_s17  }
   0xf   :  { %s28_s19 = sshll.u32 %s3240_s18, 4  ;;  %s3241_s5 = smov 64   ;;  %s29_s19 = int_to_ptr.vmem [resolvable:$true] %s28_s19 }
  0x10   :  { %s3242_s20 = smov 4   ;;  %s52_s0 = sshll.u32 %s3449_s2, 4  ;;  %s53_s0 = int_to_ptr.hbm [resolvable:$true] %s52_s0 }
  0x11   :  { %34 = dma.hbm_to_vmem [thread:$0]  %s27_s15, 128, %s29_s19, [#allocation3], %s3241_s5, %s3241_s5, %s3242_s20  }
  0x12   :  { %s3243_s23 = smov [#allocation7]   ;;  %s76_s29 = sshll.u32 %s3451_s4, 4  ;;  %s77_s29 = int_to_ptr.hbm [resolvable:$true] %s76_s29 }
  0x13   :  { %s54_s24 = sshll.u32 %s3243_s23, 4  ;;  %s3244_s1 = smov [#allocation10]   ;;  %s55_s24 = int_to_ptr.vmem [resolvable:$true] %s54_s24 }
  0x14   :  { %60 = dma.hbm_to_vmem [thread:$0]  %s53_s0, 256, %s55_s24, [#allocation6], %s3234_s25, %s3234_s25, %s3235_s26  }
  0x15   :  { %s78_s30 = sshll.u32 %s3244_s1, 4  ;;  %s3245_s12 = smov 384   ;;  %s79_s30 = int_to_ptr.vmem [resolvable:$true] %s78_s30 }
  0x16   :  { %s3246_s13 = smov 24   ;;  %s104_s14 = sshll.u32 %s3454_s7, 4  ;;  %s105_s14 = int_to_ptr.hbm [resolvable:$true] %s104_s14 }
  0x17   :  { %84 = dma.hbm_to_vmem [thread:$0]  %s77_s29, 6144, %s79_s30, [#allocation9], %s3245_s12, %s3245_s12, %s3246_s13  }
  0x18   :  { %s3247_s15 = smov [#allocation13]   ;;  %s119_s21 = sshll.u32 %s3456_s9, 4  ;;  %s120_s21 = int_to_ptr.hbm [resolvable:$true] %s119_s21 }
  0x19   :  { %s106_s18 = sshll.u32 %s3247_s15, 4  ;;  %s3248_s25 = smov [#allocation14]   ;;  %s107_s18 = int_to_ptr.vmem [resolvable:$true] %s106_s18 }
  0x1a   :  { %112 = dma.hbm_to_vmem [thread:$0]  %s105_s14, 6144, %s107_s18, [#allocation12], %s3238_s16, %s3238_s16, %s3239_s17  }
  0x1b   :  { %s121_s26 = sshll.u32 %s3248_s25, 4  ;;  %s122_s26 = int_to_ptr.vmem [resolvable:$true] %s121_s26 }
  0x1c   :  { %127 = dma.hbm_to_vmem [thread:$0]  %s120_s21, 2048, %s122_s26, [#allocation15], %s3241_s5, %s3241_s5, %s3242_s20  }
  0x1d   :  { %3221 = dma.done.wait [#allocation3], 128  }
  0x1e   :  { %3222 = vsyncadd [#allocation3], 4294967168 }
  0x1f   :  { %3223 = dma.done.wait [#allocation6], 512  }
  0x20   :  { %3224 = vsyncadd [#allocation6], 4294966784 }
  0x21   :  { %3225 = dma.done.wait [#allocation9], 6272  }
  0x22   :  { %3226 = vsyncadd [#allocation9], 4294961024 }
  0x23   :  { %3227 = dma.done.wait [#allocation12], 12288  }
  0x24   :  { %3228 = vsyncadd [#allocation12], 4294955008 }
  0x25   :  { %3229 = dma.done.wait [#allocation15], 2048  }
  0x26   :  { %3230 = vsyncadd [#allocation15], 4294965248  ;;  %v2286_v0 = vld [vmem:[#allocation10 + $0x150] sm:$0xf]  ;;  %v2813_v1 = vld [vmem:[#allocation10 + $0x164] sm:$0xf0] }
  0x27   :  { %v2810_v2 = vld [vmem:[#allocation10 + $0x154] sm:$0xf]  ;;  %v2287_v3 = vor.u32 %v2813_v1, %v2286_v0  ;;  %v2288_v4 = vld [vmem:[#allocation10 + $0x168] sm:$0xf0]  ;;  %v2262_v5 = vld [vmem:[#allocation10 + $0x120] sm:$0xf] }
  0x28   :  { %v2807_v6 = vld [vmem:[#allocation10 + $0x134] sm:$0xf0]  ;;  %v2291_v7 = vor.u32 %v2810_v2, %v2288_v4  ;;  %v2804_v8 = vld [vmem:[#allocation10 + $0x124] sm:$0xf]  ;;  %v2264_v9 = vld [vmem:[#allocation10 + $0x138] sm:$0xf0] }
  0x29   :  { %463 = vmatpush.bf16.msra.mxu0 %v2287_v3  ;;  %v2263_v10 = vor.u32 %v2807_v6, %v2262_v5  ;;  %v2267_v11 = vor.u32 %v2804_v8, %v2264_v9  ;;  %v2238_v12 = vld [vmem:[#allocation10 + $0xf0] sm:$0xf]  ;;  %v2801_v13 = vld [vmem:[#allocation10 + $0x104] sm:$0xf0]  ;;  %v2798_v14 = vld [vmem:[#allocation10 + $0xf4] sm:$0xf] }
  0x2a   :  { %477 = vmatpush.bf16.msra.mxu1 %v2291_v7  ;;  %v2240_v15 = vld [vmem:[#allocation10 + $0x108] sm:$0xf0]  ;;  %v2239_v16 = vor.u32 %v2801_v13, %v2238_v12  ;;  %v2214_v18 = vld [vmem:[#allocation10 + $0xc0] sm:$0xf]  ;;  %v2795_v19 = vld [vmem:[#allocation10 + $0xd4] sm:$0xf0] }
  0x2b   :  { %v2243_v17 = vor.u32 %v2798_v14, %v2240_v15  ;;  %v2792_v20 = vld [vmem:[#allocation10 + $0xc4] sm:$0xf]  ;;  %v2216_v21 = vld [vmem:[#allocation10 + $0xd8] sm:$0xf0]  ;;  %v2215_v22 = vor.u32 %v2795_v19, %v2214_v18  ;;  %v2190_v24 = vld [vmem:[#allocation10 + $0x90] sm:$0xf] }
  0x2c   :  { %v2219_v23 = vor.u32 %v2792_v20, %v2216_v21  ;;  %v2789_v25 = vld [vmem:[#allocation10 + $0xa4] sm:$0xf0]  ;;  %v2786_v26 = vld [vmem:[#allocation10 + $0x94] sm:$0xf]  ;;  %v2192_v27 = vld [vmem:[#allocation10 + $0xa8] sm:$0xf0] }
  0x2d   :  { %464 = vmatpush.bf16.msra.mxu0 %v2263_v10  ;;  %v2191_v28 = vor.u32 %v2789_v25, %v2190_v24  ;;  %v2195_v29 = vor.u32 %v2786_v26, %v2192_v27  ;;  %v2166_v30 = vld [vmem:[#allocation10 + $0x60] sm:$0xf]  ;;  %v2783_v31 = vld [vmem:[#allocation10 + $0x74] sm:$0xf0]  ;;  %v2780_v32 = vld [vmem:[#allocation10 + $0x64] sm:$0xf] }
  0x2e   :  { %478 = vmatpush.bf16.msra.mxu1 %v2267_v11  ;;  %v2168_v33 = vld [vmem:[#allocation10 + $0x78] sm:$0xf0]  ;;  %v2167_v34 = vor.u32 %v2783_v31, %v2166_v30  ;;  %v2142_v36 = vld [vmem:[#allocation10 + $0x30] sm:$0xf]  ;;  %v2777_v37 = vld [vmem:[#allocation10 + $0x44] sm:$0xf0] }
  0x2f   :  { %v2171_v35 = vor.u32 %v2780_v32, %v2168_v33  ;;  %v2774_v38 = vld [vmem:[#allocation10 + $0x34] sm:$0xf]  ;;  %v2144_v39 = vld [vmem:[#allocation10 + $0x48] sm:$0xf0]  ;;  %v2143_v40 = vor.u32 %v2777_v37, %v2142_v36  ;;  %v2118_v42 = vld [vmem:[#allocation10] sm:$0xf] }
  0x30   :  { %v2147_v41 = vor.u32 %v2774_v38, %v2144_v39  ;;  %v2771_v43 = vld [vmem:[#allocation10 + $0x14] sm:$0xf0]  ;;  %v2768_v44 = vld [vmem:[#allocation10 + $0x4] sm:$0xf]  ;;  %v2120_v45 = vld [vmem:[#allocation10 + $0x18] sm:$0xf0] }
  0x31   :  { %465 = vmatpush.bf16.msra.mxu0 %v2239_v16  ;;  %v2302_v46 = vld [vmem:[#allocation10 + $0x160] sm:$0xf]  ;;  %v2815_v47 = vld [vmem:[#allocation10 + $0x174] sm:$0xf0]  ;;  %v2119_v48 = vor.u32 %v2771_v43, %v2118_v42  ;;  %v2123_v49 = vor.u32 %v2768_v44, %v2120_v45  ;;  %v2278_v51 = vld [vmem:[#allocation10 + $0x130] sm:$0xf] }
  0x32   :  { %479 = vmatpush.bf16.msra.mxu1 %v2243_v17  ;;  %v2303_v50 = vor.u32 %v2815_v47, %v2302_v46  ;;  %v2809_v52 = vld [vmem:[#allocation10 + $0x144] sm:$0xf0]  ;;  %v3352_v53 = vld [vmem:[#allocation2] sm:$0xff]  ;;  %v2294_v54 = vld [vmem:[#allocation10 + $0x158] sm:$0xf]  ;;  %vm589_vm0 = vcmask 130048  }
  0x33   :  { %v2814_v55 = vld [vmem:[#allocation10 + $0x16c] sm:$0xf0]  ;;  %v2270_v56 = vld [vmem:[#allocation10 + $0x128] sm:$0xf]  ;;  %v2279_v57 = vor.u32 %v2809_v52, %v2278_v51  ;;  %v2808_v59 = vld [vmem:[#allocation10 + $0x13c] sm:$0xf0] }
  0x34   :  { %v2295_v58 = vor.u32 %v2814_v55, %v2294_v54  ;;  %v2254_v60 = vld [vmem:[#allocation10 + $0x100] sm:$0xf]  ;;  %v2803_v61 = vld [vmem:[#allocation10 + $0x114] sm:$0xf0]  ;;  %v2271_v62 = vor.u32 %v2808_v59, %v2270_v56  ;;  %v2802_v0 = vld [vmem:[#allocation10 + $0x10c] sm:$0xf0] }
  0x35   :  { %466 = vmatpush.bf16.msra.mxu0 %v2215_v22  ;;  %v2246_v63 = vld [vmem:[#allocation10 + $0xf8] sm:$0xf]  ;;  %v2255_v1 = vor.u32 %v2803_v61, %v2254_v60  ;;  %v2230_v2 = vld [vmem:[#allocation10 + $0xd0] sm:$0xf]  ;;  %v2797_v3 = vld [vmem:[#allocation10 + $0xe4] sm:$0xf0] }
  0x36   :  { %480 = vmatpush.bf16.msra.mxu1 %v2219_v23  ;;  %491 = vmatpush.bf16.msra.mxu2 %v2295_v58  ;;  %v2247_v4 = vor.u32 %v2802_v0, %v2246_v63  ;;  %v2222_v5 = vld [vmem:[#allocation10 + $0xc8] sm:$0xf]  ;;  %v2796_v6 = vld [vmem:[#allocation10 + $0xdc] sm:$0xf0]  ;;  %v2231_v7 = vor.u32 %v2797_v3, %v2230_v2  ;;  %v2791_v9 = vld [vmem:[#allocation10 + $0xb4] sm:$0xf0] }
  0x37   :  { %v2206_v8 = vld [vmem:[#allocation10 + $0xa0] sm:$0xf]  ;;  %v2223_v10 = vor.u32 %v2796_v6, %v2222_v5  ;;  %v2182_v12 = vld [vmem:[#allocation10 + $0x70] sm:$0xf]  ;;  %v2785_v13 = vld [vmem:[#allocation10 + $0x84] sm:$0xf0] }
  0x38   :  { %v2207_v11 = vor.u32 %v2791_v9, %v2206_v8  ;;  %v2183_v14 = vor.u32 %v2785_v13, %v2182_v12  ;;  %v2158_v15 = vld [vmem:[#allocation10 + $0x40] sm:$0xf]  ;;  %v2779_v16 = vld [vmem:[#allocation10 + $0x54] sm:$0xf0]  ;;  %v2134_v18 = vld [vmem:[#allocation10 + $0x10] sm:$0xf] }
  0x39   :  { %467 = vmatpush.bf16.msra.mxu0 %v2191_v28  ;;  %v2159_v17 = vor.u32 %v2779_v16, %v2158_v15  ;;  %v2773_v19 = vld [vmem:[#allocation10 + $0x24] sm:$0xf0]  ;;  %v2198_v21 = vld [vmem:[#allocation10 + $0x98] sm:$0xf]  ;;  %v2790_v22 = vld [vmem:[#allocation10 + $0xac] sm:$0xf0] }
  0x3a   :  { %481 = vmatpush.bf16.msra.mxu1 %v2195_v29  ;;  %492 = vmatpush.bf16.msra.mxu2 %v2271_v62  ;;  %v2135_v20 = vor.u32 %v2773_v19, %v2134_v18  ;;  %v2199_v23 = vor.u32 %v2790_v22, %v2198_v21  ;;  %v2174_v24 = vld [vmem:[#allocation10 + $0x68] sm:$0xf]  ;;  %v2784_v25 = vld [vmem:[#allocation10 + $0x7c] sm:$0xf0]  ;;  %v2150_v27 = vld [vmem:[#allocation10 + $0x38] sm:$0xf] }
  0x3b   :  { %v2175_v26 = vor.u32 %v2784_v25, %v2174_v24  ;;  %v2778_v28 = vld [vmem:[#allocation10 + $0x4c] sm:$0xf0]  ;;  %v2126_v30 = vld [vmem:[#allocation10 + $0x8] sm:$0xf]  ;;  %v2772_v31 = vld [vmem:[#allocation10 + $0x1c] sm:$0xf0] }
  0x3c   :  { %v2151_v29 = vor.u32 %v2778_v28, %v2150_v27  ;;  %v2127_v32 = vor.u32 %v2772_v31, %v2126_v30  ;;  %v2812_v33 = vld [vmem:[#allocation10 + $0x164] sm:$0xf]  ;;  %v2280_v37 = vld [vmem:[#allocation10 + $0x148] sm:$0xf0]  ;;  %v2256_v42 = vld [vmem:[#allocation10 + $0x118] sm:$0xf0] }
  0x3d   :  { %468 = vmatpush.bf16.msra.mxu0 %v2167_v34  ;;  %v2304_v34 = vld [vmem:[#allocation10 + $0x178] sm:$0xf0]  ;;  %v2794_v43 = vld [vmem:[#allocation10 + $0xd4] sm:$0xf]  ;;  %v2232_v45 = vld [vmem:[#allocation10 + $0xe8] sm:$0xf0] }
  0x3e   :  { %482 = vmatpush.bf16.msra.mxu1 %v2171_v35  ;;  %493 = vmatpush.bf16.msra.mxu2 %v2247_v4  ;;  %v2806_v35 = vld [vmem:[#allocation10 + $0x134] sm:$0xf]  ;;  %v2307_v36 = vor.u32 %v2812_v33, %v2304_v34  ;;  %v2208_v51 = vld [vmem:[#allocation10 + $0xb8] sm:$0xf0]  ;;  %v2184_v55 = vld [vmem:[#allocation10 + $0x88] sm:$0xf0] }
  0x3f   :  { %v2782_v54 = vld [vmem:[#allocation10 + $0x74] sm:$0xf]  ;;  %v2160_v58 = vld [vmem:[#allocation10 + $0x58] sm:$0xf0]  ;;  %v2136_v61 = vld [vmem:[#allocation10 + $0x28] sm:$0xf0] }
  0x40   :  { %v2187_v56 = vor.u32 %v2782_v54, %v2184_v55  ;;  %v2770_v60 = vld [vmem:[#allocation10 + $0x14] sm:$0xf]  ;;  %v3359_v9 = vld [vmem:[#allocation5] sm:$0xff]  ;;  %v2805_v13 = vld [vmem:[#allocation10 + $0x12c] sm:$0xf]  ;;  %s2098_s13 = sshll.u32 %s3458_s11, 4  ;;  %s2099_s13 = int_to_ptr.hbm [resolvable:$true] %s2098_s13 }
  0x41   :  { %469 = vmatpush.bf16.msra.mxu0 %v2143_v40  ;;  %v2283_v40 = vor.u32 %v2806_v35, %v2280_v37  ;;  %v2139_v62 = vor.u32 %v2770_v60, %v2136_v61  ;;  %v2296_v12 = vld [vmem:[#allocation10 + $0x170] sm:$0xf0]  ;;  %v3362_v18 = vld [vmem:[#allocation5 + $0x8] sm:$0xff]  ;;  %v2769_v55 = vld [vmem:[#allocation10 + $0xc] sm:$0xf] }
  0x42   :  { %483 = vmatpush.bf16.msra.mxu1 %v2147_v41  ;;  %494 = vmatpush.bf16.msra.mxu2 %v2223_v10  ;;  %v2800_v41 = vld [vmem:[#allocation10 + $0x104] sm:$0xf]  ;;  %v3367_v31 = vld [vmem:[#allocation7 + $0x8] sm:$0xff] }
  0x43   :  { %v2259_v44 = vor.u32 %v2800_v41, %v2256_v42  ;;  %v2793_v42 = vld [vmem:[#allocation10 + $0xcc] sm:$0xf] }
  0x45   :  { %470 = vmatpush.bf16.msra.mxu0 %v2119_v48 }
  0x46   :  { %484 = vmatpush.bf16.msra.mxu1 %v2123_v49  ;;  %495 = vmatpush.bf16.msra.mxu2 %v2199_v23  ;;  %v2235_v49 = vor.u32 %v2794_v43, %v2232_v45  ;;  %v2224_v43 = vld [vmem:[#allocation10 + $0xe0] sm:$0xf0]  ;;  %v2787_v45 = vld [vmem:[#allocation10 + $0x9c] sm:$0xf] }
  0x48   :  { %471 = vmatmul.bf16.vlgmr.msra.gmra.mxu0 %v3352_v53 }
  0x49   :  { %519 = vmatpush.bf16.msrb.mxu0 %v2303_v50  ;;  %485 = vmatmul.bf16.vlgmr.msra.gmra.mxu1 %v3352_v53  ;;  %v2788_v50 = vld [vmem:[#allocation10 + $0xa4] sm:$0xf] }
  0x4a   :  { %496 = vmatpush.bf16.msra.mxu2 %v2175_v26  ;;  %533 = vmatpush.bf16.msrb.mxu1 %v2307_v36  ;;  %v2211_v52 = vor.u32 %v2788_v50, %v2208_v51  ;;  %v2775_v51 = vld [vmem:[#allocation10 + $0x3c] sm:$0xf] }
  0x4d   :  { %520 = vmatpush.bf16.msrb.mxu0 %v2279_v57  ;;  %v2776_v57 = vld [vmem:[#allocation10 + $0x44] sm:$0xf] }
  0x4e   :  { %497 = vmatpush.bf16.msra.mxu2 %v2151_v29  ;;  %534 = vmatpush.bf16.msrb.mxu1 %v2283_v40  ;;  %v2163_v59 = vor.u32 %v2776_v57, %v2160_v58  ;;  %v2248_v40 = vld [vmem:[#allocation10 + $0x110] sm:$0xf0] }
  0x51   :  { %521 = vmatpush.bf16.msrb.mxu0 %v2255_v1 }
  0x52   :  { %498 = vmatpush.bf16.msra.mxu2 %v2127_v32  ;;  %535 = vmatpush.bf16.msrb.mxu1 %v2259_v44  ;;  %v3369_v32 = vld [vmem:[#allocation7] sm:$0xff]  ;;  %v2227_v44 = vor.u32 %v2793_v42, %v2224_v43 }
  0x55   :  { %522 = vmatpush.bf16.msrb.mxu0 %v2231_v7  ;;  %499 = vmatmul.bf16.vlgmr.msra.gmra.mxu2 %v3352_v53 }
  0x56   :  { %536 = vmatpush.bf16.msrb.mxu1 %v2235_v49  ;;  %v2176_v49 = vld [vmem:[#allocation10 + $0x80] sm:$0xf0] }
  0x59   :  { %523 = vmatpush.bf16.msrb.mxu0 %v2207_v11  ;;  %v2811_v11 = vld [vmem:[#allocation10 + $0x15c] sm:$0xf] }
  0x5a   :  { %537 = vmatpush.bf16.msrb.mxu1 %v2211_v52  ;;  %v2299_v16 = vor.u32 %v2811_v11, %v2296_v12  ;;  %v2152_v52 = vld [vmem:[#allocation10 + $0x50] sm:$0xf0] }
  0x5b   :  { %v2155_v54 = vor.u32 %v2775_v51, %v2152_v52 }
  0x5c   :  { %505 = vmatpush.bf16.msra.mxu3 %v2299_v16 }
  0x5d   :  { %524 = vmatpush.bf16.msrb.mxu0 %v2183_v14 }
  0x5e   :  { %538 = vmatpush.bf16.msrb.mxu1 %v2187_v56  ;;  %v2128_v56 = vld [vmem:[#allocation10 + $0x20] sm:$0xf0] }
  0x5f   :  { %v2131_v57 = vor.u32 %v2769_v55, %v2128_v56  ;;  %v2829_v56 = vld [vmem:[#allocation11 + $0x68] sm:$0xf0] }
  0x61   :  { %525 = vmatpush.bf16.msrb.mxu0 %v2159_v17  ;;  %v2272_v17 = vld [vmem:[#allocation10 + $0x140] sm:$0xf0] }
  0x62   :  { %539 = vmatpush.bf16.msrb.mxu1 %v2163_v59 }
  0x65   :  { %526 = vmatpush.bf16.msrb.mxu0 %v2135_v20  ;;  %v2275_v20 = vor.u32 %v2805_v13, %v2272_v17 }
  0x66   :  { %540 = vmatpush.bf16.msrb.mxu1 %v2139_v62 }
  0x67   :  { %506 = vmatpush.bf16.msra.mxu3 %v2275_v20 }
  0x68   :  { %527 = vmatmul.bf16.vlgmr.msrb.gmra.mxu0 %v3352_v53 }
  0x69   :  { %541 = vmatmul.bf16.vlgmr.msrb.gmra.mxu1 %v3352_v53 }
  0xc5   :  { %v472_v38 = vpop.f32.mrf.mxu0 }
  0xc6   :  { %v486_v39 = vpop.f32.mrf.mxu1 }
  0xc7   :  { %548 = vxpose.xlu0.b32.start [1/2] (short) (narrow) %v486_v39, 8  ;;  %v2799_v39 = vld [vmem:[#allocation10 + $0xfc] sm:$0xf] }
  0xc8   :  { %v2251_v41 = vor.u32 %v2799_v39, %v2248_v40  ;;  %v2386_v39 = vld [vmem:[#allocation11 + $0x9c] sm:$0xf0]  ;;  %v2392_v40 = vld [vmem:[#allocation11 + $0x98] sm:$0xf] }
  0xca   :  { %507 = vmatpush.bf16.msra.mxu3 %v2251_v41  ;;  %v2836_v41 = vld [vmem:[#allocation11 + $0xa0] sm:$0xf0] }
  0xcd   :  { %v474_v46 = vpop.f32.mrf.mxu0 }
  0xce   :  { %v488_v47 = vpop.f32.mrf.mxu1  ;;  %v613_v48 = vpack.c.bf16 %v474_v46, %v472_v38  ;;  %508 = vmatpush.bf16.msra.mxu3 %v2227_v44  ;;  %v2200_v46 = vld [vmem:[#allocation10 + $0xb0] sm:$0xf0]  ;;  %v2372_v44 = vld [vmem:[#allocation11 + $0x78] sm:$0xf] }
  0xcf   :  { %549 = vxpose.xlu0.b32.end [2/2] (short) (narrow) %v488_v47, 8  ;;  %v2203_v47 = vor.u32 %v2787_v45, %v2200_v46  ;;  %v2393_v45 = vor.u32 %v2836_v41, %v2392_v40  ;;  %v2832_v46 = vld [vmem:[#allocation11 + $0x80] sm:$0xf0]  ;;  %v2314_v41 = vld [vmem:[#allocation11 + $0xc] sm:$0xf0] }
  0xd0   :  { %627 = vmatpush.bf16.msrb.mxu2 %v613_v48  ;;  %v2781_v48 = vld [vmem:[#allocation10 + $0x6c] sm:$0xf]  ;;  %v2373_v51 = vor.u32 %v2832_v46, %v2372_v44  ;;  %v2492_v46 = vld [vmem:[#allocation13 + $0xa8] sm:$0xf] }
  0xd1   :  { %v2179_v50 = vor.u32 %v2781_v48, %v2176_v49  ;;  %v2374_v48 = vld [vmem:[#allocation11 + $0x84] sm:$0xf0]  ;;  %v2380_v49 = vld [vmem:[#allocation11 + $0x80] sm:$0xf] }
  0xd2   :  { %509 = vmatpush.bf16.msra.mxu3 %v2203_v47  ;;  %v2831_v47 = vld [vmem:[#allocation11 + $0x7c] sm:$0xf] }
  0xd3   :  { %v2377_v52 = vor.u32 %v2831_v47, %v2374_v48  ;;  %v2862_v47 = vld [vmem:[#allocation13 + $0xb0] sm:$0xf0]  ;;  %v2861_v48 = vld [vmem:[#allocation13 + $0xac] sm:$0xf] }
  0xd6   :  { %510 = vmatpush.bf16.msra.mxu3 %v2179_v50  ;;  %v2833_v50 = vld [vmem:[#allocation11 + $0x88] sm:$0xf0] }
  0xd7   :  { %v2381_v55 = vor.u32 %v2833_v50, %v2380_v49  ;;  %v2493_v49 = vor.u32 %v2862_v47, %v2492_v46  ;;  %v2494_v50 = vld [vmem:[#allocation13 + $0xb4] sm:$0xf0]  ;;  %v2428_v46 = vld [vmem:[#allocation13 + $0x20] sm:$0xf]  ;;  %v2845_v47 = vld [vmem:[#allocation13 + $0x28] sm:$0xf0] }
  0xd8   :  { %v500_v1 = vpop.f32.mrf.mxu2 }
  0xd9   :  { %1084 = vmatpush.bf16.msra.mxu1 %v2493_v49  ;;  %v2429_v49 = vor.u32 %v2845_v47, %v2428_v46 }
  0xda   :  { %511 = vmatpush.bf16.msra.mxu3 %v2155_v54  ;;  %v2360_v54 = vld [vmem:[#allocation11 + $0x60] sm:$0xf] }
  0xde   :  { %512 = vmatpush.bf16.msra.mxu3 %v2131_v57  ;;  %v2828_v57 = vld [vmem:[#allocation11 + $0x64] sm:$0xf] }
  0xe0   :  { %v502_v3 = vpop.f32.mrf.mxu2 }
  0xe1   :  { %513 = vmatmul.bf16.vlgmr.msra.gmra.mxu3 %v3352_v53 }
  0xe5   :  { %v528_v63 = vpop.f32.mrf.mxu0 }
  0xe6   :  { %635 = vxpose.xlu1.b32.start [1/2] (short) (narrow) %v528_v63, 8  ;;  %v542_v23 = vpop.f32.mrf.mxu1 }
  0xed   :  { %v530_v0 = vpop.f32.mrf.mxu0 }
  0xee   :  { %636 = vxpose.xlu1.b32.end [2/2] (short) (narrow) %v530_v0, 8  ;;  %v544_v25 = vpop.f32.mrf.mxu1 }
 0x16b   :  { %v564_v2 = vpop.trf.xlu0 }
 0x16c   :  { %v580_v4 = vperm.slane %v564_v2, 0 }
 0x16e   :  { %v581_v5 = vadd.f32 %v580_v4, %v500_v1  ;;  %v582_v6 = vadd.f32 %v580_v4, %v502_v3 }
 0x170   :  { %v583_v7 = vmul.f32 0.2, %v581_v5  ;;  %v584_v8 = vmul.f32 0.2, %v582_v6 }
 0x172   :  { %v585_v10 = vmax.f32 %v581_v5, %v583_v7  ;;  %v586_v14 = vmax.f32 %v582_v6, %v584_v8 }
 0x174   :  { %v587_v15 = vadd.f32 %v585_v10, %v3359_v9  ;;  %v588_v21 = vadd.f32 %v586_v14, %v3362_v18  ;;  %v514_v14 = vpop.f32.mrf.mxu3 }
 0x176   :  { %v590_v19 = vsel %vm589_vm0, %v587_v15, -inf  ;;  %v593_v22 = vsel %vm589_vm0, %v588_v21, -inf }
 0x177   :  { %591 = vmax.xlane.f32.xlu2 %v590_v19 }
 0x17c   :  { %v516_v16 = vpop.f32.mrf.mxu3 }
 0x17d   :  { %v699_v17 = vpack.c.bf16 %v516_v16, %v514_v14 }
 0x17f   :  { %594 = vmax.xlane.f32.xlu2 %v593_v22  ;;  %713 = vmatpush.bf16.msrb.mxu3 %v699_v17 }
 0x18a   :  { %v651_v24 = vpop.trf.xlu1 }
 0x18b   :  { %v667_v26 = vperm.slane %v651_v24, 0  ;;  %v2396_v24 = vld [vmem:[#allocation11 + $0xa8] sm:$0xf] }
 0x18d   :  { %v668_v27 = vadd.f32 %v667_v26, %v542_v23  ;;  %v669_v28 = vadd.f32 %v667_v26, %v544_v25  ;;  %v2838_v25 = vld [vmem:[#allocation11 + $0xb0] sm:$0xf0]  ;;  %v2837_v26 = vld [vmem:[#allocation11 + $0xac] sm:$0xf] }
 0x18f   :  { %v670_v29 = vmul.f32 0.2, %v668_v27  ;;  %v671_v30 = vmul.f32 0.2, %v669_v28 }
 0x191   :  { %v673_v33 = vmax.f32 %v669_v28, %v671_v30  ;;  %v672_v34 = vmax.f32 %v668_v27, %v670_v29  ;;  %v2397_v28 = vor.u32 %v2838_v25, %v2396_v24  ;;  %v2398_v29 = vld [vmem:[#allocation11 + $0xb4] sm:$0xf0]  ;;  %v2404_v30 = vld [vmem:[#allocation11 + $0xb0] sm:$0xf]  ;;  %v2824_v25 = vld [vmem:[#allocation11 + $0x40] sm:$0xf0] }
 0x192   :  { %v2344_v24 = vld [vmem:[#allocation11 + $0x38] sm:$0xf] }
 0x193   :  { %v675_v35 = vadd.f32 %v673_v33, %v3367_v31  ;;  %v674_v36 = vadd.f32 %v672_v34, %v3369_v32  ;;  %v2839_v33 = vld [vmem:[#allocation11 + $0xb8] sm:$0xf0]  ;;  %v2401_v34 = vor.u32 %v2837_v26, %v2398_v29  ;;  %882 = vmatpush.bf16.msra.mxu2 %v2397_v28  ;;  %v2324_v28 = vld [vmem:[#allocation11 + $0x18] sm:$0xf]  ;;  %v2820_v29 = vld [vmem:[#allocation11 + $0x20] sm:$0xf0] }
 0x195   :  { %v679_v37 = vsel %vm589_vm0, %v675_v35, -inf  ;;  %v676_v38 = vsel %vm589_vm0, %v674_v36, -inf  ;;  %896 = vmatpush.bf16.msra.mxu3 %v2401_v34  ;;  %v2332_v34 = vld [vmem:[#allocation11 + $0x20] sm:$0xf] }
 0x196   :  { %680 = vmax.xlane.f32.xlu1 %v679_v37  ;;  %677 = vmax.xlane.f32.xlu0 %v676_v38  ;;  %v2835_v37 = vld [vmem:[#allocation11 + $0x98] sm:$0xf0]  ;;  %v2834_v38 = vld [vmem:[#allocation11 + $0x94] sm:$0xf] }
 0x197   :  { %v2389_v43 = vor.u32 %v2834_v38, %v2386_v39  ;;  %v2817_v38 = vld [vmem:[#allocation11 + $0x8] sm:$0xf0]  ;;  %v2816_v39 = vld [vmem:[#allocation11 + $0x4] sm:$0xf] }
 0x198   :  { %v2317_v44 = vor.u32 %v2816_v39, %v2314_v41  ;;  %v2844_v41 = vld [vmem:[#allocation13 + $0x20] sm:$0xf0] }
 0x199   :  { %897 = vmatpush.bf16.msra.mxu3 %v2389_v43  ;;  %v2818_v43 = vld [vmem:[#allocation11 + $0x10] sm:$0xf0] }
 0x19d   :  { %898 = vmatpush.bf16.msra.mxu3 %v2377_v52  ;;  %v2863_v52 = vld [vmem:[#allocation13 + $0xb8] sm:$0xf0] }
 0x1ea   :  { %v592_v58 = vpop.xlane.xlu2 %591 }
 0x1eb   :  { %v596_v59 = vsub.f32 %v587_v15, %v592_v58  ;;  %v2362_v58 = vld [vmem:[#allocation11 + $0x6c] sm:$0xf0] }
 0x1ed   :  { %v598_v60 = vmul.f32 1.442695, %v596_v59  ;;  %v2368_v59 = vld [vmem:[#allocation11 + $0x68] sm:$0xf] }
 0x1ef   :  { %2953 = vpow2.f32 %v598_v60  ;;  %v2830_v60 = vld [vmem:[#allocation11 + $0x70] sm:$0xf0] }
 0x1f2   :  { %v595_v61 = vpop.xlane.xlu2 %594 }
 0x1f3   :  { %v597_v62 = vsub.f32 %v588_v21, %v595_v61 }
 0x1f5   :  { %v2954_v63 = vpop.eup %2953  ;;  %v600_v0 = vmul.f32 1.442695, %v597_v62  ;;  %v2361_v62 = vor.u32 %v2829_v56, %v2360_v54  ;;  %v2497_v54 = vor.u32 %v2861_v48, %v2494_v50  ;;  %v2480_v56 = vld [vmem:[#allocation13 + $0x90] sm:$0xf] }
 0x1f6   :  { %v602_v1 = vsel %vm589_vm0, %v2954_v63, 0.0  ;;  %v2946_v50 = vld [vmem:[%s3453_s6] ss:$0 sm:$0xff] }
 0x1f7   :  { %2955 = vpow2.f32 %v600_v0  ;;  %603 = vadd.xlane.f32.xlu2 %v602_v1  ;;  %v2348_v0 = vld [vmem:[#allocation11 + $0x48] sm:$0xf]  ;;  %v2369_v1 = vor.u32 %v2830_v60, %v2368_v59  ;;  %v2482_v60 = vld [vmem:[#allocation13 + $0x9c] sm:$0xf0] }
 0x1fd   :  { %v2956_v2 = vpop.eup %2955 }
 0x1fe   :  { %v605_v3 = vsel %vm589_vm0, %v2956_v2, 0.0 }
 0x1ff   :  { %606 = vadd.xlane.f32.xlu2 %v605_v3  ;;  %v2825_v3 = vld [vmem:[#allocation11 + $0x4c] sm:$0xf] }
 0x209   :  { %v678_v4 = vpop.xlane.xlu0 %677  ;;  %v681_v5 = vpop.xlane.xlu1 %680 }
 0x20a   :  { %v682_v6 = vsub.f32 %v674_v36, %v678_v4  ;;  %v683_v7 = vsub.f32 %v675_v35, %v681_v5  ;;  %v2405_v35 = vor.u32 %v2839_v33, %v2404_v30  ;;  %v2384_v36 = vld [vmem:[#allocation11 + $0x90] sm:$0xf]  ;;  %v2350_v4 = vld [vmem:[#allocation11 + $0x54] sm:$0xf0]  ;;  %v2819_v30 = vld [vmem:[#allocation11 + $0x1c] sm:$0xf]  ;;  %v2325_v33 = vor.u32 %v2820_v29, %v2324_v28 }
 0x20b   :  { %v2385_v42 = vor.u32 %v2835_v37, %v2384_v36  ;;  %v2356_v5 = vld [vmem:[#allocation11 + $0x50] sm:$0xf]  ;;  %v2312_v37 = vld [vmem:[#allocation11] sm:$0xf] }
 0x20c   :  { %v684_v53 = vmul.f32 1.442695, %v682_v6  ;;  %v686_v8 = vmul.f32 1.442695, %v683_v7  ;;  %910 = vmatpush.bf16.msra.mxu0 %v2405_v35  ;;  %v2827_v6 = vld [vmem:[#allocation11 + $0x58] sm:$0xf0]  ;;  %v2353_v7 = vor.u32 %v2825_v3, %v2350_v4  ;;  %v2313_v40 = vor.u32 %v2817_v38, %v2312_v37 }
 0x20d   :  { %883 = vmatpush.bf16.msra.mxu2 %v2385_v42  ;;  %v2320_v42 = vld [vmem:[#allocation11 + $0x8] sm:$0xf]  ;;  %v2855_v3 = vld [vmem:[#allocation13 + $0x7c] sm:$0xf]  ;;  %v2848_v37 = vld [vmem:[#allocation13 + $0x40] sm:$0xf0] }
 0x20e   :  { %2957 = vpow2.f32 %v684_v53 }
 0x20f   :  { %2959 = vpow2.f32 %v686_v8  ;;  %v2357_v8 = vor.u32 %v2827_v6, %v2356_v5  ;;  %v2470_v5 = vld [vmem:[#allocation13 + $0x84] sm:$0xf0]  ;;  %v2476_v6 = vld [vmem:[#allocation13 + $0x80] sm:$0xf] }
 0x210   :  { %911 = vmatpush.bf16.msra.mxu0 %v2393_v45  ;;  %v2321_v45 = vor.u32 %v2818_v43, %v2320_v42  ;;  %v2843_v42 = vld [vmem:[#allocation13 + $0x1c] sm:$0xf] }
 0x211   :  { %884 = vmatpush.bf16.msra.mxu2 %v2373_v51  ;;  %v2500_v51 = vld [vmem:[#allocation13 + $0xb0] sm:$0xf] }
 0x214   :  { %v3378_v10 = vpop.eup %2957  ;;  %912 = vmatpush.bf16.msra.mxu0 %v2381_v55  ;;  %v2501_v55 = vor.u32 %v2863_v52, %v2500_v51  ;;  %v2408_v51 = vld [vmem:[#allocation13] sm:$0xf]  ;;  %v2841_v52 = vld [vmem:[#allocation13 + $0x8] sm:$0xf0] }
 0x215   :  { %v688_v11 = vsel %vm589_vm0, %v3378_v10, 0.0  ;;  %v3382_v12 = vpop.eup %2959  ;;  %885 = vmatpush.bf16.msra.mxu2 %v2361_v62  ;;  %v2860_v62 = vld [vmem:[#allocation13 + $0xa0] sm:$0xf0] }
 0x216   :  { %689 = vadd.xlane.f32.xlu2 %v688_v11  ;;  %v691_v13 = vsel %vm589_vm0, %v3382_v12, 0.0 }
 0x218   :  { %913 = vmatpush.bf16.msra.mxu0 %v2369_v1  ;;  %v2468_v1 = vld [vmem:[#allocation13 + $0x78] sm:$0xf] }
 0x21c   :  { %914 = vmatpush.bf16.msra.mxu0 %v2357_v8 }
 0x21e   :  { %692 = vadd.xlane.f32.xlu2 %v691_v13 }
 0x26a   :  { %v604_v15 = vpop.xlane.xlu2 %603 }
 0x26b   :  { %2961 = vrcp.f32 %v604_v15 }
 0x271   :  { %v2962_v20 = vpop.eup %2961 }
 0x272   :  { %v607_v19 = vpop.xlane.xlu2 %606  ;;  %v610_v22 = vmul.f32 %v2962_v20, %v2954_v63  ;;  %v2365_v63 = vor.u32 %v2828_v57, %v2362_v58  ;;  %v2823_v20 = vld [vmem:[#allocation11 + $0x38] sm:$0xf0]  ;;  %v2858_v58 = vld [vmem:[#allocation13 + $0x94] sm:$0xf] }
 0x273   :  { %2963 = vrcp.f32 %v607_v19  ;;  %v2336_v19 = vld [vmem:[#allocation11 + $0x30] sm:$0xf]  ;;  %v2859_v57 = vld [vmem:[#allocation13 + $0x98] sm:$0xf0] }
 0x274   :  { %899 = vmatpush.bf16.msra.mxu3 %v2365_v63  ;;  %v2481_v59 = vor.u32 %v2859_v57, %v2480_v56  ;;  %v2485_v63 = vor.u32 %v2858_v58, %v2482_v60  ;;  %v2410_v56 = vld [vmem:[#allocation13 + $0xc] sm:$0xf0]  ;;  %v2416_v57 = vld [vmem:[#allocation13 + $0x8] sm:$0xf]  ;;  %v2842_v58 = vld [vmem:[#allocation13 + $0x10] sm:$0xf0] }
 0x275   :  { %v2417_v60 = vor.u32 %v2842_v58, %v2416_v57 }
 0x276   :  { %1085 = vmatpush.bf16.msra.mxu1 %v2481_v59 }
 0x278   :  { %900 = vmatpush.bf16.msra.mxu3 %v2353_v7  ;;  %v2473_v7 = vor.u32 %v2855_v3, %v2470_v5 }
 0x279   :  { %v2964_v21 = vpop.eup %2963 }
 0x27a   :  { %v611_v23 = vmul.f32 %v2964_v21, %v2956_v2  ;;  %v2826_v2 = vld [vmem:[#allocation11 + $0x50] sm:$0xf0] }
 0x27b   :  { %v2349_v53 = vor.u32 %v2826_v2, %v2348_v0  ;;  %v2822_v21 = vld [vmem:[#allocation11 + $0x34] sm:$0xf]  ;;  %v2856_v2 = vld [vmem:[#allocation13 + $0x80] sm:$0xf0] }
 0x27c   :  { %v612_v27 = vpack.c.bf16 %v611_v23, %v610_v22  ;;  %v2337_v22 = vor.u32 %v2823_v20, %v2336_v19  ;;  %v2338_v23 = vld [vmem:[#allocation11 + $0x3c] sm:$0xf0]  ;;  %v2469_v4 = vor.u32 %v2856_v2, %v2468_v1  ;;  %v2947_v2 = vld [vmem:[%s3455_s8] ss:$0 sm:$0xff] }
 0x27d   :  { %886 = vmatpush.bf16.msra.mxu2 %v2349_v53  ;;  %v2341_v26 = vor.u32 %v2822_v21, %v2338_v23  ;;  %v2857_v53 = vld [vmem:[#allocation13 + $0x88] sm:$0xf0]  ;;  %v2850_v23 = vld [vmem:[#allocation13 + $0x50] sm:$0xf0] }
 0x27e   :  { %2308 = vmatmul.msk.bf16.vlgmr.msrb.gmra.mxu2 %vm589_vm0, %v612_v27  ;;  %v2345_v27 = vor.u32 %v2824_v25, %v2344_v24  ;;  %v2477_v8 = vor.u32 %v2857_v53, %v2476_v6  ;;  %1086 = vmatpush.bf16.msra.mxu1 %v2469_v4  ;;  %v2849_v24 = vld [vmem:[#allocation13 + $0x4c] sm:$0xf]  ;;  %v2446_v25 = vld [vmem:[#allocation13 + $0x54] sm:$0xf0] }
 0x27f   :  { %901 = vmatpush.bf16.msra.mxu3 %v2341_v26  ;;  %v2452_v26 = vld [vmem:[#allocation13 + $0x50] sm:$0xf]  ;;  %v2449_v29 = vor.u32 %v2849_v24, %v2446_v25 }
 0x280   :  { %915 = vmatpush.bf16.msra.mxu0 %v2345_v27  ;;  %v2851_v27 = vld [vmem:[#allocation13 + $0x58] sm:$0xf0] }
 0x281   :  { %887 = vmatpush.bf16.msra.mxu2 %v2337_v22  ;;  %v2444_v22 = vld [vmem:[#allocation13 + $0x48] sm:$0xf] }
 0x282   :  { %v2445_v28 = vor.u32 %v2850_v23, %v2444_v22 }
 0x285   :  { %888 = vmatpush.bf16.msra.mxu2 %v2325_v33  ;;  %v2432_v33 = vld [vmem:[#allocation13 + $0x30] sm:$0xf] }
 0x289   :  { %v690_v61 = vpop.xlane.xlu2 %689  ;;  %889 = vmatpush.bf16.msra.mxu2 %v2313_v40  ;;  %v2420_v40 = vld [vmem:[#allocation13 + $0x18] sm:$0xf] }
 0x28a   :  { %2965 = vrcp.f32 %v690_v61  ;;  %v2488_v61 = vld [vmem:[#allocation13 + $0x98] sm:$0xf] }
 0x28b   :  { %v2489_v0 = vor.u32 %v2860_v62, %v2488_v61 }
 0x28d   :  { %1098 = vmatpush.bf16.msrb.mxu2 %v2497_v54  ;;  %v2840_v54 = vld [vmem:[#allocation13 + $0x4] sm:$0xf] }
 0x28e   :  { %v2413_v59 = vor.u32 %v2840_v54, %v2410_v56 }
 0x290   :  { %v2966_v13 = vpop.eup %2965 }
 0x291   :  { %v693_v11 = vpop.xlane.xlu2 %692  ;;  %v696_v15 = vmul.f32 %v2966_v13, %v3378_v10  ;;  %v2326_v10 = vld [vmem:[#allocation11 + $0x24] sm:$0xf0]  ;;  %1099 = vmatpush.bf16.msrb.mxu2 %v2485_v63  ;;  %v2853_v13 = vld [vmem:[#allocation13 + $0x68] sm:$0xf0] }
 0x292   :  { %2967 = vrcp.f32 %v693_v11  ;;  %v2329_v35 = vor.u32 %v2819_v30, %v2326_v10  ;;  %v2456_v11 = vld [vmem:[#allocation13 + $0x60] sm:$0xf]  ;;  %v2453_v30 = vor.u32 %v2851_v27, %v2452_v26  ;;  %v2847_v10 = vld [vmem:[#allocation13 + $0x38] sm:$0xf0] }
 0x293   :  { %v2457_v19 = vor.u32 %v2853_v13, %v2456_v11 }
 0x294   :  { %902 = vmatpush.bf16.msra.mxu3 %v2329_v35  ;;  %v2434_v35 = vld [vmem:[#allocation13 + $0x3c] sm:$0xf0] }
 0x295   :  { %1100 = vmatpush.bf16.msrb.mxu2 %v2473_v7  ;;  %1087 = vmatpush.bf16.msra.mxu1 %v2457_v19 }
 0x298   :  { %v2968_v14 = vpop.eup %2967  ;;  %903 = vmatpush.bf16.msra.mxu3 %v2317_v44  ;;  %v2421_v44 = vor.u32 %v2844_v41, %v2420_v40 }
 0x299   :  { %v697_v16 = vmul.f32 %v2968_v14, %v3382_v12  ;;  %v2821_v12 = vld [vmem:[#allocation11 + $0x28] sm:$0xf0]  ;;  %v2852_v14 = vld [vmem:[#allocation13 + $0x64] sm:$0xf]  ;;  %1088 = vmatpush.bf16.msra.mxu1 %v2445_v28 }
 0x29a   :  { %v2333_v36 = vor.u32 %v2821_v12, %v2332_v34  ;;  %v2846_v34 = vld [vmem:[#allocation13 + $0x34] sm:$0xf]  ;;  %v2433_v12 = vor.u32 %v2847_v10, %v2432_v33 }
 0x29b   :  { %v698_v17 = vpack.c.bf16 %v697_v16, %v696_v15  ;;  %v2458_v15 = vld [vmem:[#allocation13 + $0x6c] sm:$0xf0]  ;;  %v2464_v16 = vld [vmem:[#allocation13 + $0x68] sm:$0xf]  ;;  %v2437_v38 = vor.u32 %v2846_v34, %v2434_v35 }
 0x29c   :  { %916 = vmatpush.bf16.msra.mxu0 %v2333_v36  ;;  %v2461_v20 = vor.u32 %v2852_v14, %v2458_v15  ;;  %v2440_v36 = vld [vmem:[#allocation13 + $0x38] sm:$0xf] }
 0x29d   :  { %2309 = vmatmul.msk.bf16.vlgmr.msrb.gmra.mxu3 %vm589_vm0, %v698_v17  ;;  %v2854_v17 = vld [vmem:[#allocation13 + $0x70] sm:$0xf0]  ;;  %v2441_v39 = vor.u32 %v2848_v37, %v2440_v36  ;;  %1089 = vmatpush.bf16.msra.mxu1 %v2433_v12 }
 0x29e   :  { %1112 = vmatpush.bf16.msrb.mxu3 %v2501_v55  ;;  %v2465_v21 = vor.u32 %v2854_v17, %v2464_v16  ;;  %1101 = vmatpush.bf16.msrb.mxu2 %v2461_v20  ;;  %v2409_v55 = vor.u32 %v2841_v52, %v2408_v51 }
 0x2a0   :  { %917 = vmatpush.bf16.msra.mxu0 %v2321_v45  ;;  %v2422_v45 = vld [vmem:[#allocation13 + $0x24] sm:$0xf0] }
 0x2a1   :  { %v2425_v48 = vor.u32 %v2843_v42, %v2422_v45  ;;  %1090 = vmatpush.bf16.msra.mxu1 %v2421_v44 }
 0x2a2   :  { %1113 = vmatpush.bf16.msrb.mxu3 %v2489_v0  ;;  %1102 = vmatpush.bf16.msrb.mxu2 %v2449_v29 }
 0x2a5   :  { %1091 = vmatpush.bf16.msra.mxu1 %v2409_v55 }
 0x2a6   :  { %1114 = vmatpush.bf16.msrb.mxu3 %v2477_v8  ;;  %1103 = vmatpush.bf16.msrb.mxu2 %v2437_v38 }
 0x2aa   :  { %1115 = vmatpush.bf16.msrb.mxu3 %v2465_v21  ;;  %1104 = vmatpush.bf16.msrb.mxu2 %v2425_v48 }
 0x2ae   :  { %1116 = vmatpush.bf16.msrb.mxu3 %v2453_v30  ;;  %1105 = vmatpush.bf16.msrb.mxu2 %v2413_v59 }
 0x2b2   :  { %1117 = vmatpush.bf16.msrb.mxu3 %v2441_v39 }
 0x2b6   :  { %1118 = vmatpush.bf16.msrb.mxu3 %v2429_v49 }
 0x2ba   :  { %1119 = vmatpush.bf16.msrb.mxu3 %v2417_v60 }
 0x301   :  { %v629_v43 = vpop.f32.mrf.mxu2 }
 0x302   :  { %v630_v62 = vadd.f32 %v2946_v50, %v629_v43 }
 0x309   :  { %v631_v61 = vpop.f32.mrf.mxu2 }
 0x30a   :  { %v632_v63 = vadd.f32 %v2946_v50, %v631_v61 }
 0x30c   :  { %v720_v0 = vpack.c.bf16 %v632_v63, %v630_v62 }
 0x30e   :  { %890 = vmatmul.bf16.vlgmr.msra.gmra.mxu2 %v720_v0  ;;  %904 = vmatmul.bf16.vlgmr.msra.gmra.mxu3 %v720_v0 }
 0x30f   :  { %918 = vmatmul.bf16.vlgmr.msra.gmra.mxu0 %v720_v0 }
 0x320   :  { %v715_v1 = vpop.f32.mrf.mxu3 }
 0x321   :  { %v716_v4 = vadd.f32 %v2947_v2, %v715_v1 }
 0x328   :  { %v717_v3 = vpop.f32.mrf.mxu3 }
 0x329   :  { %v718_v5 = vadd.f32 %v2947_v2, %v717_v3 }
 0x32b   :  { %v721_v6 = vpack.c.bf16 %v718_v5, %v716_v4 }
 0x32d   :  { %1092 = vmatmul.bf16.vlgmr.msra.gmra.mxu1 %v721_v6  ;;  %1106 = vmatmul.bf16.vlgmr.msrb.gmra.mxu2 %v721_v6 }
 0x32e   :  { %1120 = vmatmul.bf16.vlgmr.msrb.gmra.mxu3 %v721_v6 }
 0x38c   :  { %v919_v20 = vpop.f32.mrf.mxu0 }
 0x391   :  { %v891_v53 = vpop.f32.mrf.mxu2  ;;  %v905_v7 = vpop.f32.mrf.mxu3 }
 0x392   :  { %1128 = vxpose.xlu2.b32.start [1/2] (short) (narrow) %v905_v7, 8  ;;  %v2592_v7 = vld [vmem:[#allocation11 + $0x168] sm:$0xf] }
 0x394   :  { %v921_v23 = vpop.f32.mrf.mxu0 }
 0x399   :  { %v893_v8 = vpop.f32.mrf.mxu2  ;;  %v907_v11 = vpop.f32.mrf.mxu3 }
 0x39a   :  { %v1192_v13 = vpack.c.bf16 %v893_v8, %v891_v53  ;;  %1129 = vxpose.xlu2.b32.end [2/2] (short) (narrow) %v907_v11, 8  ;;  %v2886_v8 = vld [vmem:[#allocation11 + $0x170] sm:$0xf0]  ;;  %v2885_v11 = vld [vmem:[#allocation11 + $0x16c] sm:$0xf] }
 0x39c   :  { %1206 = vmatpush.bf16.msrb.mxu0 %v1192_v13  ;;  %v2593_v13 = vor.u32 %v2886_v8, %v2592_v7  ;;  %v2522_v8 = vld [vmem:[#allocation11 + $0xe4] sm:$0xf0] }
 0x3a0   :  { %1467 = vmatpush.bf16.msra.mxu0 %v2593_v13  ;;  %v2869_v13 = vld [vmem:[#allocation11 + $0xe8] sm:$0xf0] }
 0x3aa   :  { %v1093_v14 = vpop.f32.mrf.mxu1 }
 0x3b0   :  { %v1107_v15 = vpop.f32.mrf.mxu2 }
 0x3b1   :  { %1217 = vxpose.xlu2.b32.start [1/2] (short) (narrow) %v1107_v15, 8  ;;  %v1121_v12 = vpop.f32.mrf.mxu3  ;;  %v2600_v15 = vld [vmem:[#allocation11 + $0x170] sm:$0xf] }
 0x3b2   :  { %v1095_v16 = vpop.f32.mrf.mxu1 }
 0x3b3   :  { %v1281_v17 = vpack.c.bf16 %v1095_v16, %v1093_v14  ;;  %v2594_v14 = vld [vmem:[#allocation11 + $0x174] sm:$0xf0]  ;;  %v2887_v16 = vld [vmem:[#allocation11 + $0x178] sm:$0xf0] }
 0x3b5   :  { %1295 = vmatpush.bf16.msrb.mxu1 %v1281_v17  ;;  %v2597_v17 = vor.u32 %v2885_v11, %v2594_v14  ;;  %v2528_v11 = vld [vmem:[#allocation11 + $0xe0] sm:$0xf] }
 0x3b8   :  { %v1109_v19 = vpop.f32.mrf.mxu2 }
 0x3b9   :  { %1218 = vxpose.xlu2.b32.end [2/2] (short) (narrow) %v1109_v19, 8  ;;  %v1123_v37 = vpop.f32.mrf.mxu3  ;;  %v2601_v19 = vor.u32 %v2887_v16, %v2600_v15  ;;  %1481 = vmatpush.bf16.msra.mxu1 %v2597_v17  ;;  %v2529_v15 = vor.u32 %v2869_v13, %v2528_v11  ;;  %v2508_v16 = vld [vmem:[#allocation11 + $0xc0] sm:$0xf]  ;;  %v2865_v17 = vld [vmem:[#allocation11 + $0xc8] sm:$0xf0] }
 0x3bb   :  { %1495 = vmatpush.bf16.msra.mxu2 %v2601_v19  ;;  %v2864_v19 = vld [vmem:[#allocation11 + $0xc4] sm:$0xf] }
 0x42b   :  { %v1144_v21 = vpop.trf.xlu2 }
 0x42c   :  { %v1160_v22 = vperm.slane %v1144_v21, 0  ;;  %v2883_v21 = vld [vmem:[#allocation11 + $0x158] sm:$0xf0] }
 0x42e   :  { %v1161_v24 = vadd.f32 %v1160_v22, %v919_v20  ;;  %v1162_v25 = vadd.f32 %v1160_v22, %v921_v23  ;;  %v2580_v20 = vld [vmem:[#allocation11 + $0x150] sm:$0xf]  ;;  %v2882_v22 = vld [vmem:[#allocation11 + $0x154] sm:$0xf] }
 0x42f   :  { %v2581_v23 = vor.u32 %v2883_v21, %v2580_v20  ;;  %v2509_v20 = vor.u32 %v2865_v17, %v2508_v16  ;;  %v2510_v21 = vld [vmem:[#allocation11 + $0xcc] sm:$0xf0]  ;;  %v2896_v16 = vld [vmem:[#allocation13 + $0x100] sm:$0xf0] }
 0x430   :  { %v1163_v26 = vmul.f32 0.2, %v1161_v24  ;;  %v1164_v27 = vmul.f32 0.2, %v1162_v25 }
 0x431   :  { %1468 = vmatpush.bf16.msra.mxu0 %v2581_v23  ;;  %v2866_v23 = vld [vmem:[#allocation11 + $0xd0] sm:$0xf0] }
 0x432   :  { %v1165_v28 = vmax.f32 %v1161_v24, %v1163_v26  ;;  %v1166_v29 = vmax.f32 %v1162_v25, %v1164_v27  ;;  %v2582_v24 = vld [vmem:[#allocation11 + $0x15c] sm:$0xf0]  ;;  %v2588_v25 = vld [vmem:[#allocation11 + $0x158] sm:$0xf]  ;;  %v2884_v26 = vld [vmem:[#allocation11 + $0x160] sm:$0xf0] }
 0x433   :  { %v2585_v27 = vor.u32 %v2882_v22, %v2582_v24  ;;  %v2516_v22 = vld [vmem:[#allocation11 + $0xc8] sm:$0xf]  ;;  %v2513_v24 = vor.u32 %v2864_v19, %v2510_v21 }
 0x434   :  { %v1167_v30 = vadd.f32 %v1165_v28, %v3359_v9  ;;  %v1168_v33 = vadd.f32 %v1166_v29, %v3362_v18  ;;  %v2589_v28 = vor.u32 %v2884_v26, %v2588_v25  ;;  %v2568_v29 = vld [vmem:[#allocation11 + $0x138] sm:$0xf]  ;;  %v2517_v25 = vor.u32 %v2866_v23, %v2516_v22  ;;  %v2688_v26 = vld [vmem:[#allocation13 + $0x168] sm:$0xf] }
 0x435   :  { %1482 = vmatpush.bf16.msra.mxu1 %v2585_v27  ;;  %v2910_v27 = vld [vmem:[#allocation13 + $0x170] sm:$0xf0]  ;;  %v2616_v23 = vld [vmem:[#allocation13 + $0xd8] sm:$0xf] }
 0x436   :  { %v1169_v10 = vsel %vm589_vm0, %v1167_v30, -inf  ;;  %v1172_v34 = vsel %vm589_vm0, %v1168_v33, -inf  ;;  %1496 = vmatpush.bf16.msra.mxu2 %v2589_v28  ;;  %v2909_v28 = vld [vmem:[#allocation13 + $0x16c] sm:$0xf] }
 0x437   :  { %1170 = vmax.xlane.f32.xlu1 %v1169_v10  ;;  %1173 = vmax.xlane.f32.xlu2 %v1172_v34  ;;  %v2570_v10 = vld [vmem:[#allocation11 + $0x144] sm:$0xf0]  ;;  %v2576_v34 = vld [vmem:[#allocation11 + $0x140] sm:$0xf] }
 0x44a   :  { %v1233_v35 = vpop.trf.xlu2 }
 0x44b   :  { %v1249_v36 = vperm.slane %v1233_v35, 0 }
 0x44d   :  { %v1250_v38 = vadd.f32 %v1249_v36, %v1121_v12  ;;  %v1251_v39 = vadd.f32 %v1249_v36, %v1123_v37  ;;  %v2881_v12 = vld [vmem:[#allocation11 + $0x148] sm:$0xf0] }
 0x44e   :  { %v2577_v37 = vor.u32 %v2881_v12, %v2576_v34 }
 0x44f   :  { %v1252_v40 = vmul.f32 0.2, %v1250_v38  ;;  %v1253_v41 = vmul.f32 0.2, %v1251_v39 }
 0x450   :  { %1497 = vmatpush.bf16.msra.mxu2 %v2577_v37  ;;  %v2906_v37 = vld [vmem:[#allocation13 + $0x154] sm:$0xf] }
 0x451   :  { %v1254_v42 = vmax.f32 %v1250_v38, %v1252_v40  ;;  %v1255_v18 = vmax.f32 %v1251_v39, %v1253_v41  ;;  %v2556_v38 = vld [vmem:[#allocation11 + $0x120] sm:$0xf]  ;;  %v2877_v39 = vld [vmem:[#allocation11 + $0x128] sm:$0xf0]  ;;  %v2876_v40 = vld [vmem:[#allocation11 + $0x124] sm:$0xf] }
 0x452   :  { %v2558_v41 = vld [vmem:[#allocation11 + $0x12c] sm:$0xf0] }
 0x453   :  { %v1256_v43 = vadd.f32 %v1254_v42, %v3369_v32  ;;  %v1257_v44 = vadd.f32 %v1255_v18, %v3367_v31  ;;  %v2564_v42 = vld [vmem:[#allocation11 + $0x128] sm:$0xf]  ;;  %v2561_v18 = vor.u32 %v2876_v40, %v2558_v41  ;;  %v2684_v40 = vld [vmem:[#allocation13 + $0x158] sm:$0xf]  ;;  %v2908_v41 = vld [vmem:[#allocation13 + $0x160] sm:$0xf0] }
 0x455   :  { %v1258_v9 = vsel %vm589_vm0, %v1256_v43, -inf  ;;  %v1261_v45 = vsel %vm589_vm0, %v1257_v44, -inf }
 0x456   :  { %1259 = vmax.xlane.f32.xlu1 %v1258_v9  ;;  %v2557_v9 = vor.u32 %v2877_v39, %v2556_v38  ;;  %v2678_v39 = vld [vmem:[#allocation13 + $0x15c] sm:$0xf0] }
 0x45e   :  { %1262 = vmax.xlane.f32.xlu1 %v1261_v45 }
 0x4aa   :  { %v1171_v46 = vpop.xlane.xlu1 %1170  ;;  %v1174_v47 = vpop.xlane.xlu2 %1173 }
 0x4ab   :  { %v1175_v48 = vsub.f32 %v1167_v30, %v1171_v46  ;;  %v1176_v49 = vsub.f32 %v1168_v33, %v1174_v47  ;;  %v2880_v30 = vld [vmem:[#allocation11 + $0x140] sm:$0xf0]  ;;  %v2879_v33 = vld [vmem:[#allocation11 + $0x13c] sm:$0xf] }
 0x4ac   :  { %v2569_v35 = vor.u32 %v2880_v30, %v2568_v29  ;;  %v2573_v36 = vor.u32 %v2879_v33, %v2570_v10  ;;  %v2689_v29 = vor.u32 %v2910_v27, %v2688_v26  ;;  %v2690_v30 = vld [vmem:[#allocation13 + $0x174] sm:$0xf0]  ;;  %v2696_v33 = vld [vmem:[#allocation13 + $0x170] sm:$0xf]  ;;  %v2911_v10 = vld [vmem:[#allocation13 + $0x178] sm:$0xf0] }
 0x4ad   :  { %v1177_v50 = vmul.f32 1.442695, %v1175_v48  ;;  %v1179_v51 = vmul.f32 1.442695, %v1176_v49  ;;  %v2693_v34 = vor.u32 %v2909_v28, %v2690_v30  ;;  %v2697_v12 = vor.u32 %v2911_v10, %v2696_v33  ;;  %v2891_v26 = vld [vmem:[#allocation13 + $0xdc] sm:$0xf] }
 0x4ae   :  { %1469 = vmatpush.bf16.msra.mxu0 %v2569_v35  ;;  %1483 = vmatpush.bf16.msra.mxu1 %v2573_v36  ;;  %v2676_v35 = vld [vmem:[#allocation13 + $0x150] sm:$0xf]  ;;  %v2907_v36 = vld [vmem:[#allocation13 + $0x158] sm:$0xf0]  ;;  %v2618_v27 = vld [vmem:[#allocation13 + $0xe4] sm:$0xf0] }
 0x4af   :  { %2969 = vpow2.f32 %v1177_v50  ;;  %1670 = vmatpush.bf16.msra.mxu3 %v2689_v29  ;;  %v2677_v38 = vor.u32 %v2907_v36, %v2676_v35  ;;  %v2624_v28 = vld [vmem:[#allocation13 + $0xe0] sm:$0xf]  ;;  %v2621_v30 = vor.u32 %v2891_v26, %v2618_v27  ;;  %v2893_v33 = vld [vmem:[#allocation13 + $0xe8] sm:$0xf0]  ;;  %v2888_v35 = vld [vmem:[#allocation13 + $0xc4] sm:$0xf] }
 0x4b0   :  { %2971 = vpow2.f32 %v1179_v51  ;;  %v2625_v10 = vor.u32 %v2893_v33, %v2624_v28 }
 0x4b2   :  { %1470 = vmatpush.bf16.msra.mxu0 %v2557_v9  ;;  %1484 = vmatpush.bf16.msra.mxu1 %v2561_v18  ;;  %v2664_v9 = vld [vmem:[#allocation13 + $0x138] sm:$0xf]  ;;  %v2904_v18 = vld [vmem:[#allocation13 + $0x140] sm:$0xf0] }
 0x4b3   :  { %1671 = vmatpush.bf16.msra.mxu3 %v2677_v38  ;;  %v2612_v38 = vld [vmem:[#allocation13 + $0xc8] sm:$0xf] }
 0x4b5   :  { %v2970_v52 = vpop.eup %2969 }
 0x4b6   :  { %v2972_v54 = vpop.eup %2971  ;;  %v1181_v32 = vsel %vm589_vm0, %v2970_v52, 0.0 }
 0x4b7   :  { %1182 = vadd.xlane.f32.xlu0 %v1181_v32  ;;  %v1184_v55 = vsel %vm589_vm0, %v2972_v54, 0.0  ;;  %v2873_v32 = vld [vmem:[#allocation11 + $0x10c] sm:$0xf] }
 0x4b8   :  { %1185 = vadd.xlane.f32.xlu1 %v1184_v55 }
 0x4c9   :  { %v1260_v31 = vpop.xlane.xlu1 %1259 }
 0x4ca   :  { %v1264_v56 = vsub.f32 %v1256_v43, %v1260_v31  ;;  %v2878_v43 = vld [vmem:[#allocation11 + $0x130] sm:$0xf0]  ;;  %v2546_v31 = vld [vmem:[#allocation11 + $0x114] sm:$0xf0] }
 0x4cc   :  { %v1266_v57 = vmul.f32 1.442695, %v1264_v56  ;;  %v2552_v56 = vld [vmem:[#allocation11 + $0x110] sm:$0xf] }
 0x4ce   :  { %2973 = vpow2.f32 %v1266_v57  ;;  %v2875_v57 = vld [vmem:[#allocation11 + $0x118] sm:$0xf0] }
 0x4d1   :  { %v1263_v58 = vpop.xlane.xlu1 %1262 }
 0x4d2   :  { %v1265_v59 = vsub.f32 %v1257_v44, %v1263_v58  ;;  %v2565_v44 = vor.u32 %v2878_v43, %v2564_v42  ;;  %v2549_v58 = vor.u32 %v2873_v32, %v2546_v31  ;;  %v2681_v42 = vor.u32 %v2906_v37, %v2678_v39  ;;  %v2654_v32 = vld [vmem:[#allocation13 + $0x12c] sm:$0xf0]  ;;  %v2902_v31 = vld [vmem:[#allocation13 + $0x130] sm:$0xf0] }
 0x4d3   :  { %v2685_v43 = vor.u32 %v2908_v41, %v2684_v40  ;;  %v2606_v37 = vld [vmem:[#allocation13 + $0xcc] sm:$0xf0]  ;;  %v2890_v39 = vld [vmem:[#allocation13 + $0xd0] sm:$0xf0] }
 0x4d4   :  { %v3406_v60 = vpop.eup %2973  ;;  %v1268_v61 = vmul.f32 1.442695, %v1265_v59  ;;  %1498 = vmatpush.bf16.msra.mxu2 %v2565_v44  ;;  %v2553_v59 = vor.u32 %v2875_v57, %v2552_v56  ;;  %1485 = vmatpush.bf16.msra.mxu1 %v2549_v58  ;;  %v2903_v44 = vld [vmem:[#allocation13 + $0x13c] sm:$0xf]  ;;  %v2609_v40 = vor.u32 %v2888_v35, %v2606_v37  ;;  %v2613_v41 = vor.u32 %v2890_v39, %v2612_v38 }
 0x4d5   :  { %v1270_v62 = vsel %vm589_vm0, %v3406_v60, 0.0 }
 0x4d6   :  { %2975 = vpow2.f32 %v1268_v61  ;;  %1271 = vadd.xlane.f32.xlu0 %v1270_v62  ;;  %v2532_v61 = vld [vmem:[#allocation11 + $0xf0] sm:$0xf]  ;;  %v2871_v62 = vld [vmem:[#allocation11 + $0xf8] sm:$0xf0] }
 0x4d8   :  { %1499 = vmatpush.bf16.msra.mxu2 %v2553_v59 }
 0x4dc   :  { %v3410_v63 = vpop.eup %2975 }
 0x4dd   :  { %v1273_v0 = vsel %vm589_vm0, %v3410_v63, 0.0 }
 0x4de   :  { %1274 = vadd.xlane.f32.xlu1 %v1273_v0  ;;  %v2533_v0 = vor.u32 %v2871_v62, %v2532_v61  ;;  %v2948_v61 = vld [vmem:[%s3453_s6 + $0x1] ss:$0 sm:$0xff]  ;;  %v2640_v62 = vld [vmem:[#allocation13 + $0x108] sm:$0xf] }
 0x52a   :  { %v1183_v1 = vpop.xlane.xlu0 %1182 }
 0x52b   :  { %2977 = vrcp.f32 %v1183_v1  ;;  %v1186_v2 = vpop.xlane.xlu1 %1185  ;;  %v2540_v1 = vld [vmem:[#allocation11 + $0xf8] sm:$0xf] }
 0x52c   :  { %2979 = vrcp.f32 %v1186_v2  ;;  %v2872_v2 = vld [vmem:[#allocation11 + $0x100] sm:$0xf0] }
 0x531   :  { %v2978_v3 = vpop.eup %2977 }
 0x532   :  { %v2980_v4 = vpop.eup %2979  ;;  %v1189_v5 = vmul.f32 %v2978_v3, %v2970_v52  ;;  %v2544_v52 = vld [vmem:[#allocation11 + $0x108] sm:$0xf] }
 0x533   :  { %v1190_v6 = vmul.f32 %v2980_v4, %v2972_v54  ;;  %v2874_v54 = vld [vmem:[#allocation11 + $0x110] sm:$0xf0]  ;;  %v2541_v4 = vor.u32 %v2872_v2, %v2540_v1  ;;  %v2642_v1 = vld [vmem:[#allocation13 + $0x114] sm:$0xf0]  ;;  %v2648_v2 = vld [vmem:[#allocation13 + $0x110] sm:$0xf] }
 0x534   :  { %v2545_v55 = vor.u32 %v2874_v54, %v2544_v52  ;;  %v2901_v52 = vld [vmem:[#allocation13 + $0x128] sm:$0xf0]  ;;  %v2900_v54 = vld [vmem:[#allocation13 + $0x124] sm:$0xf] }
 0x535   :  { %v1191_v53 = vpack.c.bf16 %v1190_v6, %v1189_v5  ;;  %1500 = vmatpush.bf16.msra.mxu2 %v2541_v4  ;;  %v2520_v5 = vld [vmem:[#allocation11 + $0xd8] sm:$0xf]  ;;  %v2868_v6 = vld [vmem:[#allocation11 + $0xe0] sm:$0xf0]  ;;  %v2657_v57 = vor.u32 %v2900_v54, %v2654_v32  ;;  %v2899_v4 = vld [vmem:[#allocation13 + $0x118] sm:$0xf0] }
 0x536   :  { %1471 = vmatpush.bf16.msra.mxu0 %v2545_v55  ;;  %v2521_v7 = vor.u32 %v2868_v6, %v2520_v5  ;;  %v2660_v55 = vld [vmem:[#allocation13 + $0x128] sm:$0xf]  ;;  %v2649_v5 = vor.u32 %v2899_v4, %v2648_v2 }
 0x537   :  { %2503 = vmatmul.msk.bf16.vlgmr.msrb.gmra.mxu0 %vm589_vm0, %v1191_v53  ;;  %v2867_v53 = vld [vmem:[#allocation11 + $0xdc] sm:$0xf]  ;;  %v2661_v58 = vor.u32 %v2902_v31, %v2660_v55 }
 0x538   :  { %v2525_v14 = vor.u32 %v2867_v53, %v2522_v8  ;;  %v2628_v53 = vld [vmem:[#allocation13 + $0xf0] sm:$0xf]  ;;  %v2894_v8 = vld [vmem:[#allocation13 + $0xf4] sm:$0xf] }
 0x539   :  { %1501 = vmatpush.bf16.msra.mxu2 %v2529_v15  ;;  %v2636_v15 = vld [vmem:[#allocation13 + $0xf8] sm:$0xf] }
 0x53a   :  { %1472 = vmatpush.bf16.msra.mxu0 %v2533_v0 }
 0x53d   :  { %1502 = vmatpush.bf16.msra.mxu2 %v2517_v25 }
 0x53e   :  { %1473 = vmatpush.bf16.msra.mxu0 %v2521_v7  ;;  %v2895_v7 = vld [vmem:[#allocation13 + $0xf8] sm:$0xf0] }
 0x53f   :  { %v2629_v13 = vor.u32 %v2895_v7, %v2628_v53 }
 0x542   :  { %1474 = vmatpush.bf16.msra.mxu0 %v2509_v20  ;;  %v2637_v20 = vor.u32 %v2896_v16, %v2636_v15 }
 0x546   :  { %1684 = vmatpush.bf16.msrb.mxu0 %v2693_v34  ;;  %v2604_v34 = vld [vmem:[#allocation13 + $0xc0] sm:$0xf] }
 0x549   :  { %v1272_v45 = vpop.xlane.xlu0 %1271 }
 0x54a   :  { %2981 = vrcp.f32 %v1272_v45  ;;  %v2666_v45 = vld [vmem:[#allocation13 + $0x144] sm:$0xf0]  ;;  %1685 = vmatpush.bf16.msrb.mxu0 %v2681_v42 }
 0x550   :  { %v2982_v47 = vpop.eup %2981 }
 0x551   :  { %v1275_v46 = vpop.xlane.xlu1 %1274  ;;  %v1278_v49 = vmul.f32 %v2982_v47, %v3406_v60  ;;  %v2870_v60 = vld [vmem:[#allocation11 + $0xf4] sm:$0xf]  ;;  %v2905_v47 = vld [vmem:[#allocation13 + $0x148] sm:$0xf0] }
 0x552   :  { %2983 = vrcp.f32 %v1275_v46  ;;  %v2672_v46 = vld [vmem:[#allocation13 + $0x140] sm:$0xf] }
 0x558   :  { %v2984_v48 = vpop.eup %2983 }
 0x559   :  { %v1279_v50 = vmul.f32 %v2984_v48, %v3410_v63  ;;  %v2534_v63 = vld [vmem:[#allocation11 + $0xfc] sm:$0xf0]  ;;  %v2665_v48 = vor.u32 %v2904_v18, %v2664_v9 }
 0x55a   :  { %v2537_v3 = vor.u32 %v2870_v60, %v2534_v63  ;;  %v2898_v60 = vld [vmem:[#allocation13 + $0x110] sm:$0xf0]  ;;  %v2897_v63 = vld [vmem:[#allocation13 + $0x10c] sm:$0xf] }
 0x55b   :  { %v1280_v51 = vpack.c.bf16 %v1279_v50, %v1278_v49  ;;  %v2669_v49 = vor.u32 %v2903_v44, %v2666_v45  ;;  %v2673_v50 = vor.u32 %v2905_v47, %v2672_v46  ;;  %1672 = vmatpush.bf16.msra.mxu3 %v2665_v48  ;;  %v2641_v0 = vor.u32 %v2898_v60, %v2640_v62 }
 0x55c   :  { %1486 = vmatpush.bf16.msra.mxu1 %v2537_v3  ;;  %v2645_v3 = vor.u32 %v2897_v63, %v2642_v1 }
 0x55d   :  { %2505 = vmatmul.msk.bf16.vlgmr.msrb.gmra.mxu1 %vm589_vm0, %v1280_v51  ;;  %v2652_v51 = vld [vmem:[#allocation13 + $0x120] sm:$0xf]  ;;  %1686 = vmatpush.bf16.msrb.mxu0 %v2669_v49 }
 0x55e   :  { %v2653_v56 = vor.u32 %v2901_v52, %v2652_v51 }
 0x560   :  { %1487 = vmatpush.bf16.msra.mxu1 %v2525_v14  ;;  %1673 = vmatpush.bf16.msra.mxu3 %v2653_v56  ;;  %v2630_v14 = vld [vmem:[#allocation13 + $0xfc] sm:$0xf0] }
 0x561   :  { %1687 = vmatpush.bf16.msrb.mxu0 %v2657_v57  ;;  %v2633_v19 = vor.u32 %v2894_v8, %v2630_v14 }
 0x564   :  { %1488 = vmatpush.bf16.msra.mxu1 %v2513_v24  ;;  %1674 = vmatpush.bf16.msra.mxu3 %v2641_v0  ;;  %v2892_v24 = vld [vmem:[#allocation13 + $0xe0] sm:$0xf0] }
 0x565   :  { %1688 = vmatpush.bf16.msrb.mxu0 %v2645_v3  ;;  %v2617_v25 = vor.u32 %v2892_v24, %v2616_v23  ;;  %v3001_v3 = vld [vmem:[#allocation5] sm:$0xff] }
 0x568   :  { %1698 = vmatpush.bf16.msrb.mxu1 %v2697_v12  ;;  %1675 = vmatpush.bf16.msra.mxu3 %v2629_v13  ;;  %v2889_v12 = vld [vmem:[#allocation13 + $0xc8] sm:$0xf0] }
 0x569   :  { %1689 = vmatpush.bf16.msrb.mxu0 %v2633_v19  ;;  %v2605_v36 = vor.u32 %v2889_v12, %v2604_v34 }
 0x56c   :  { %1699 = vmatpush.bf16.msrb.mxu1 %v2685_v43  ;;  %1676 = vmatpush.bf16.msra.mxu3 %v2617_v25  ;;  %v2949_v43 = vld [vmem:[%s3455_s8 + $0x1] ss:$0 sm:$0xff] }
 0x56d   :  { %1690 = vmatpush.bf16.msrb.mxu0 %v2621_v30  ;;  %v3004_v25 = vld [vmem:[#allocation7 + $0x8] sm:$0xff] }
 0x570   :  { %1700 = vmatpush.bf16.msrb.mxu1 %v2673_v50  ;;  %1677 = vmatpush.bf16.msra.mxu3 %v2605_v36 }
 0x571   :  { %1691 = vmatpush.bf16.msrb.mxu0 %v2609_v40 }
 0x574   :  { %1701 = vmatpush.bf16.msrb.mxu1 %v2661_v58 }
 0x578   :  { %1702 = vmatpush.bf16.msrb.mxu1 %v2649_v5  ;;  %v3002_v5 = vld [vmem:[#allocation5 + $0x8] sm:$0xff] }
 0x57c   :  { %1703 = vmatpush.bf16.msrb.mxu1 %v2637_v20 }
 0x580   :  { %1704 = vmatpush.bf16.msrb.mxu1 %v2625_v10 }
 0x584   :  { %1705 = vmatpush.bf16.msrb.mxu1 %v2613_v41 }
 0x5b4   :  { %v1208_v59 = vpop.f32.mrf.mxu0 }
 0x5b5   :  { %v1209_v6 = vadd.f32 %v2948_v61, %v1208_v59 }
 0x5b7   :  { %v1213_v21 = vmax.f32 %v1209_v6, 0.0 }
 0x5bc   :  { %v1210_v11 = vpop.f32.mrf.mxu0 }
 0x5bd   :  { %v1211_v17 = vadd.f32 %v2948_v61, %v1210_v11 }
 0x5bf   :  { %v1214_v22 = vmax.f32 %v1211_v17, 0.0 }
 0x5c1   :  { %v1304_v29 = vpack.c.bf16 %v1214_v22, %v1213_v21  ;;  %v3003_v21 = vld [vmem:[#allocation7] sm:$0xff] }
 0x5c3   :  { %1475 = vmatmul.bf16.vlgmr.msra.gmra.mxu0 %v1304_v29  ;;  %1489 = vmatmul.bf16.vlgmr.msra.gmra.mxu1 %v1304_v29 }
 0x5c4   :  { %1503 = vmatmul.bf16.vlgmr.msra.gmra.mxu2 %v1304_v29 }
 0x5da   :  { %v1297_v42 = vpop.f32.mrf.mxu1 }
 0x5db   :  { %v1298_v9 = vadd.f32 %v2949_v43, %v1297_v42 }
 0x5dd   :  { %v1302_v45 = vmax.f32 %v1298_v9, 0.0 }
 0x5e2   :  { %v1299_v18 = vpop.f32.mrf.mxu1 }
 0x5e3   :  { %v1300_v44 = vadd.f32 %v2949_v43, %v1299_v18 }
 0x5e5   :  { %v1303_v46 = vmax.f32 %v1300_v44, 0.0 }
 0x5e7   :  { %v1305_v47 = vpack.c.bf16 %v1303_v46, %v1302_v45 }
 0x5e9   :  { %1678 = vmatmul.bf16.vlgmr.msra.gmra.mxu3 %v1305_v47  ;;  %1692 = vmatmul.bf16.vlgmr.msrb.gmra.mxu0 %v1305_v47 }
 0x5ea   :  { %1706 = vmatmul.bf16.vlgmr.msrb.gmra.mxu1 %v1305_v47 }
 0x640   :  { %v1476_v48 = vpop.f32.mrf.mxu0  ;;  %v1490_v49 = vpop.f32.mrf.mxu1 }
 0x641   :  { %1714 = vxpose.xlu0.b32.start [1/2] (short) (narrow) %v1490_v49, 8 }
 0x647   :  { %v1504_v57 = vpop.f32.mrf.mxu2 }
 0x648   :  { %v1478_v50 = vpop.f32.mrf.mxu0  ;;  %v1492_v51 = vpop.f32.mrf.mxu1 }
 0x649   :  { %v1778_v52 = vpack.c.bf16 %v1478_v50, %v1476_v48  ;;  %1715 = vxpose.xlu0.b32.end [2/2] (short) (narrow) %v1492_v51, 8 }
 0x64b   :  { %1792 = vmatpush.bf16.msrb.mxu2 %v1778_v52 }
 0x64f   :  { %v1506_v61 = vpop.f32.mrf.mxu2 }
 0x666   :  { %v1693_v54 = vpop.f32.mrf.mxu0 }
 0x667   :  { %1803 = vxpose.xlu1.b32.start [1/2] (short) (narrow) %v1693_v54, 8  ;;  %v1707_v8 = vpop.f32.mrf.mxu1  ;;  %v2919_v54 = vld [vmem:[#allocation14 + $0x38] sm:$0xff] }
 0x668   :  { %2038 = vmatpush.bf16.msra.mxu2 %v2919_v54 }
 0x66c   :  { %v1679_v32 = vpop.f32.mrf.mxu3 }
 0x66e   :  { %v1695_v55 = vpop.f32.mrf.mxu0 }
 0x66f   :  { %1804 = vxpose.xlu1.b32.end [2/2] (short) (narrow) %v1695_v55, 8  ;;  %v1709_v14 = vpop.f32.mrf.mxu1  ;;  %v2917_v55 = vld [vmem:[#allocation14 + $0x28] sm:$0xff] }
 0x674   :  { %v1681_v31 = vpop.f32.mrf.mxu3 }
 0x675   :  { %v1867_v56 = vpack.c.bf16 %v1681_v31, %v1679_v32  ;;  %v2918_v32 = vld [vmem:[#allocation14 + $0x30] sm:$0xff] }
 0x676   :  { %2039 = vmatpush.bf16.msra.mxu2 %v2918_v32 }
 0x677   :  { %1881 = vmatpush.bf16.msrb.mxu3 %v1867_v56 }
 0x67a   :  { %2040 = vmatpush.bf16.msra.mxu2 %v2917_v55 }
 0x6e5   :  { %v1730_v58 = vpop.trf.xlu0 }
 0x6e6   :  { %v1746_v59 = vperm.slane %v1730_v58, 0 }
 0x6e8   :  { %v1747_v62 = vadd.f32 %v1746_v59, %v1504_v57  ;;  %v1748_v60 = vadd.f32 %v1746_v59, %v1506_v61 }
 0x6ea   :  { %v1749_v0 = vmul.f32 0.2, %v1747_v62  ;;  %v1750_v63 = vmul.f32 0.2, %v1748_v60 }
 0x6ec   :  { %v1751_v1 = vmax.f32 %v1747_v62, %v1749_v0  ;;  %v1752_v2 = vmax.f32 %v1748_v60, %v1750_v63  ;;  %v2916_v60 = vld [vmem:[#allocation14 + $0x20] sm:$0xff]  ;;  %v2915_v0 = vld [vmem:[#allocation14 + $0x18] sm:$0xff]  ;;  %v2914_v63 = vld [vmem:[#allocation14 + $0x10] sm:$0xff] }
 0x6ed   :  { %2041 = vmatpush.bf16.msra.mxu2 %v2916_v60 }
 0x6ee   :  { %v1753_v4 = vadd.f32 %v3001_v3, %v1751_v1  ;;  %v1754_v6 = vadd.f32 %v3002_v5, %v1752_v2  ;;  %v2913_v1 = vld [vmem:[#allocation14 + $0x8] sm:$0xff]  ;;  %v2912_v2 = vld [vmem:[#allocation14] sm:$0xff]  ;;  %v2927_v3 = vld [vmem:[#allocation14 + $0x78] sm:$0xff] }
 0x6ef   :  { %2052 = vmatpush.bf16.msra.mxu3 %v2927_v3  ;;  %v2925_v5 = vld [vmem:[#allocation14 + $0x68] sm:$0xff] }
 0x6f0   :  { %v1755_v53 = vsel %vm589_vm0, %v1753_v4, -inf  ;;  %v1758_v7 = vsel %vm589_vm0, %v1754_v6, -inf }
 0x6f1   :  { %1756 = vmax.xlane.f32.xlu0 %v1755_v53  ;;  %1759 = vmax.xlane.f32.xlu1 %v1758_v7 }
 0x6f2   :  { %2042 = vmatpush.bf16.msra.mxu2 %v2915_v0 }
 0x6f6   :  { %2043 = vmatpush.bf16.msra.mxu2 %v2914_v63 }
 0x6fa   :  { %2044 = vmatpush.bf16.msra.mxu2 %v2913_v1 }
 0x6fe   :  { %2045 = vmatpush.bf16.msra.mxu2 %v2912_v2 }
 0x70b   :  { %v1819_v11 = vpop.trf.xlu1 }
 0x70c   :  { %v1835_v13 = vperm.slane %v1819_v11, 0 }
 0x70e   :  { %v1836_v15 = vadd.f32 %v1835_v13, %v1707_v8  ;;  %v1837_v16 = vadd.f32 %v1835_v13, %v1709_v14  ;;  %v2924_v8 = vld [vmem:[#allocation14 + $0x60] sm:$0xff]  ;;  %v2923_v14 = vld [vmem:[#allocation14 + $0x58] sm:$0xff] }
 0x710   :  { %v1838_v17 = vmul.f32 0.2, %v1836_v15  ;;  %v1839_v19 = vmul.f32 0.2, %v1837_v16 }
 0x712   :  { %v1840_v20 = vmax.f32 %v1836_v15, %v1838_v17  ;;  %v1841_v24 = vmax.f32 %v1837_v16, %v1839_v19  ;;  %v2922_v19 = vld [vmem:[#allocation14 + $0x50] sm:$0xff] }
 0x714   :  { %v1842_v22 = vadd.f32 %v3003_v21, %v1840_v20  ;;  %v1843_v26 = vadd.f32 %v3004_v25, %v1841_v24  ;;  %v2920_v25 = vld [vmem:[#allocation14 + $0x40] sm:$0xff] }
 0x716   :  { %v1844_v23 = vsel %vm589_vm0, %v1842_v22, -inf  ;;  %v1847_v27 = vsel %vm589_vm0, %v1843_v26, -inf }
 0x717   :  { %1845 = vmax.xlane.f32.xlu2 %v1844_v23  ;;  %v2921_v23 = vld [vmem:[#allocation14 + $0x48] sm:$0xff] }
 0x71f   :  { %1848 = vmax.xlane.f32.xlu2 %v1847_v27 }
 0x764   :  { %v1757_v28 = vpop.xlane.xlu0 %1756  ;;  %v1760_v29 = vpop.xlane.xlu1 %1759 }
 0x765   :  { %v1761_v30 = vsub.f32 %v1753_v4, %v1757_v28  ;;  %v1762_v10 = vsub.f32 %v1754_v6, %v1760_v29  ;;  %v2926_v4 = vld [vmem:[#allocation14 + $0x70] sm:$0xff] }
 0x766   :  { %2053 = vmatpush.bf16.msra.mxu3 %v2926_v4  ;;  %v2950_v6 = vld [vmem:[%s3453_s6 + $0x2] ss:$0 sm:$0xff] }
 0x767   :  { %v1763_v33 = vmul.f32 1.442695, %v1761_v30  ;;  %v1765_v34 = vmul.f32 1.442695, %v1762_v10 }
 0x769   :  { %2985 = vpow2.f32 %v1763_v33 }
 0x76a   :  { %2987 = vpow2.f32 %v1765_v34  ;;  %2054 = vmatpush.bf16.msra.mxu3 %v2925_v5 }
 0x76e   :  { %2055 = vmatpush.bf16.msra.mxu3 %v2924_v8 }
 0x76f   :  { %v2986_v12 = vpop.eup %2985 }
 0x770   :  { %v1767_v35 = vsel %vm589_vm0, %v2986_v12, 0.0  ;;  %v2988_v36 = vpop.eup %2987 }
 0x771   :  { %1768 = vadd.xlane.f32.xlu2 %v1767_v35  ;;  %v1770_v37 = vsel %vm589_vm0, %v2988_v36, 0.0 }
 0x772   :  { %2056 = vmatpush.bf16.msra.mxu3 %v2923_v14 }
 0x776   :  { %2057 = vmatpush.bf16.msra.mxu3 %v2922_v19 }
 0x779   :  { %1771 = vadd.xlane.f32.xlu2 %v1770_v37 }
 0x77a   :  { %2058 = vmatpush.bf16.msra.mxu3 %v2921_v23 }
 0x77e   :  { %2059 = vmatpush.bf16.msra.mxu3 %v2920_v25 }
 0x78a   :  { %v1846_v38 = vpop.xlane.xlu2 %1845 }
 0x78b   :  { %v1850_v39 = vsub.f32 %v1842_v22, %v1846_v38 }
 0x78d   :  { %v1852_v40 = vmul.f32 1.442695, %v1850_v39 }
 0x78f   :  { %2989 = vpow2.f32 %v1852_v40 }
 0x792   :  { %v1849_v41 = vpop.xlane.xlu2 %1848 }
 0x793   :  { %v1851_v42 = vsub.f32 %v1843_v26, %v1849_v41  ;;  %v2951_v26 = vld [vmem:[%s3455_s8 + $0x2] ss:$0 sm:$0xff]  ;;  %v2952_v41 = vld [vmem:[%s3457_s10] ss:$0 sm:$0xff]  ;;  %s3249_s8 = smov [#allocation16]  }
 0x794   :  { %s2096_s1 = sshll.u32 %s3249_s8, 4  ;;  %s2097_s1 = int_to_ptr.vmem [resolvable:$true] %s2096_s1 }
 0x795   :  { %v2990_v43 = vpop.eup %2989  ;;  %v1854_v9 = vmul.f32 1.442695, %v1851_v42 }
 0x796   :  { %v1856_v18 = vsel %vm589_vm0, %v2990_v43, 0.0 }
 0x797   :  { %2991 = vpow2.f32 %v1854_v9  ;;  %1857 = vadd.xlane.f32.xlu2 %v1856_v18 }
 0x79d   :  { %v2992_v44 = vpop.eup %2991 }
 0x79e   :  { %v1859_v45 = vsel %vm589_vm0, %v2992_v44, 0.0 }
 0x79f   :  { %1860 = vadd.xlane.f32.xlu2 %v1859_v45  ;;  %v2066_v45 = vld [vmem:[#allocation8] sm:$0xff] }
 0x7e4   :  { %v1769_v46 = vpop.xlane.xlu2 %1768 }
 0x7e5   :  { %2993 = vrcp.f32 %v1769_v46 }
 0x7eb   :  { %v2994_v48 = vpop.eup %2993 }
 0x7ec   :  { %v1772_v47 = vpop.xlane.xlu2 %1771  ;;  %v1775_v50 = vmul.f32 %v2994_v48, %v2986_v12 }
 0x7ed   :  { %2995 = vrcp.f32 %v1772_v47 }
 0x7f3   :  { %v2996_v49 = vpop.eup %2995 }
 0x7f4   :  { %v1776_v51 = vmul.f32 %v2996_v49, %v2988_v36 }
 0x7f6   :  { %v1777_v52 = vpack.c.bf16 %v1776_v51, %v1775_v50 }
 0x7f8   :  { %2699 = vmatmul.msk.bf16.vlgmr.msrb.gmra.mxu2 %vm589_vm0, %v1777_v52 }
 0x80a   :  { %v1858_v31 = vpop.xlane.xlu2 %1857 }
 0x80b   :  { %2997 = vrcp.f32 %v1858_v31 }
 0x811   :  { %v2998_v57 = vpop.eup %2997 }
 0x812   :  { %v1861_v56 = vpop.xlane.xlu2 %1860  ;;  %v1864_v59 = vmul.f32 %v2998_v57, %v2990_v43 }
 0x813   :  { %2999 = vrcp.f32 %v1861_v56 }
 0x819   :  { %v3000_v58 = vpop.eup %2999 }
 0x81a   :  { %v1865_v61 = vmul.f32 %v3000_v58, %v2992_v44 }
 0x81c   :  { %v1866_v62 = vpack.c.bf16 %v1865_v61, %v1864_v59 }
 0x81e   :  { %2701 = vmatmul.msk.bf16.vlgmr.msrb.gmra.mxu3 %vm589_vm0, %v1866_v62 }
 0x87b   :  { %v1794_v53 = vpop.f32.mrf.mxu2 }
 0x87c   :  { %v1795_v7 = vadd.f32 %v2950_v6, %v1794_v53 }
 0x87e   :  { %v1799_v11 = vmax.f32 %v1795_v7, 0.0 }
 0x880   :  { %v1890_v16 = vpack.c.bf16 %v1799_v11, %v1799_v11 }
 0x882   :  { %v1896_v21 = vunpack.c.l.b16 %v1890_v16 }
 0x883   :  { %v1796_v13 = vpop.f32.mrf.mxu2 }
 0x884   :  { %v1797_v15 = vadd.f32 %v2950_v6, %v1796_v13 }
 0x886   :  { %v1800_v17 = vmax.f32 %v1797_v15, 0.0 }
 0x888   :  { %v1891_v20 = vpack.c.bf16 %v1800_v17, %v1800_v17 }
 0x88a   :  { %v1897_v22 = vunpack.c.l.b16 %v1891_v20 }
 0x88c   :  { %v1898_v24 = vpack.c.b16 %v1897_v22, %v1896_v21 }
 0x88e   :  { %2046 = vmatmul.bf16.vlgmr.msra.gmra.mxu2 %v1898_v24 }
 0x8a1   :  { %v1883_v27 = vpop.f32.mrf.mxu3 }
 0x8a2   :  { %v1884_v28 = vadd.f32 %v2951_v26, %v1883_v27 }
 0x8a4   :  { %v1888_v29 = vmax.f32 %v1884_v28, 0.0 }
 0x8a6   :  { %v1892_v10 = vpack.c.bf16 %v1888_v29, %v1888_v29 }
 0x8a8   :  { %v1902_v35 = vunpack.c.l.b16 %v1892_v10 }
 0x8a9   :  { %v1885_v30 = vpop.f32.mrf.mxu3 }
 0x8aa   :  { %v1886_v33 = vadd.f32 %v2951_v26, %v1885_v30 }
 0x8ac   :  { %v1889_v34 = vmax.f32 %v1886_v33, 0.0 }
 0x8ae   :  { %v1893_v12 = vpack.c.bf16 %v1889_v34, %v1889_v34 }
 0x8b0   :  { %v1903_v36 = vunpack.c.l.b16 %v1893_v12 }
 0x8b2   :  { %v1904_v37 = vpack.c.b16 %v1903_v36, %v1902_v35 }
 0x8b4   :  { %2060 = vmatmul.bf16.vlgmr.msra.gmra.mxu3 %v1904_v37 }
 0x911   :  { %v2047_v38 = vpop.f32.mrf.mxu2 }
 0x912   :  { %v2048_v9 = vadd.f32 %v2952_v41, %v2047_v38 }
 0x919   :  { %v2049_v40 = vpop.f32.mrf.mxu2 }
 0x91a   :  { %v2050_v42 = vadd.f32 %v2952_v41, %v2049_v40 }
 0x937   :  { %v2061_v39 = vpop.f32.mrf.mxu3 }
 0x938   :  { %v2062_v44 = vadd.f32 %v2061_v39, %v2048_v9 }
 0x93f   :  { %v2063_v43 = vpop.f32.mrf.mxu3 }
 0x940   :  { %v2064_v18 = vadd.f32 %v2063_v43, %v2050_v42 }
 0x942   :  { %2084 = vmatpush.msra.mxu0 %v2064_v18 }
 0x944   :  { %2085 = vmatpush.msra.mxu0 %v2062_v44 }
 0x945   :  { %2766 = vmatmul.msk.f32.vlgmr.msra.gmra.mxu0 %vm589_vm0, %v2066_v45 }
 0x9c2   :  { %v2087_v46 = vpop.f32.mrf.mxu0 }
 0x9c3   :  { %2090 = vst [vmem:[#allocation16] sm:$0xff] %v2087_v46 }
 0x9c4   :  { %2101 = dma.vmem_to_hbm [thread:$0]  %s2097_s1, 128, %s2099_s13, [#allocation4]  }
 0x9c5   :  { %3231 = dma.done.wait [#allocation4], 128  }
 0x9c6   :  { %3232 = vsyncadd [#allocation4], 4294967168 }
 0x9c7   :  { %2106 = vsyncpa [#allocation3], 1 }
 0x9c8   :  { %2107 = vsyncpa [#allocation6], 1 }
 0x9c9   :  { %2108 = vsyncpa [#allocation9], 1 }
 0x9ca   :  { %2109 = vsyncpa [#allocation12], 1 }
 0x9cb   :  { %2110 = vsyncpa [#allocation15], 1 }
 0x9cc   :  { %2111 = vsyncpa [#allocation4], 1 }

</bundles_post_ra>
